<compile_context>
chip_gen: v7x
topology: tpu7x:2x2x1
jax: 0.10.0
libtpu: 0.0.40
codegen_flags: <defaults>
</compile_context>

<pallas_src>
import math
import functools

import jax
import jax.numpy as jnp
from jax.experimental import pallas as pl
from jax.experimental.pallas import tpu as pltpu

_INV_SQRT2 = 1.0 / math.sqrt(2.0)
_SQRT_2_OVER_PI = math.sqrt(2.0 / math.pi)


def _gelu(h, approx):
    """GELU in f32. 'tanh' -> GPT-2-style approximation (EUP tanh, cheap on the
    VPU); 'erf' -> exact nn.GELU() default (long VPU polynomial)."""
    if approx == "tanh":
        return 0.5 * h * (1.0 + jnp.tanh(_SQRT_2_OVER_PI * (h + 0.044715 * h * h * h)))
    return 0.5 * h * (1.0 + jax.lax.erf(h * _INV_SQRT2))


# ---------------------------------------------------------------------------
# Kernels
# ---------------------------------------------------------------------------

def _mlp_kernel_resident(x_ref, w1_ref, b1_ref, w2_ref, b2_ref, o_ref, *,
                         gelu_approx):
    """Both weight matrices VMEM-resident (constant index_maps): 1-D token grid,
    no accumulator scratch, no accumulator read-modify-write."""
    h = jnp.dot(x_ref[...], w1_ref[...], preferred_element_type=jnp.float32)
    h = _gelu(h + b1_ref[...].astype(jnp.float32), gelu_approx)
    y = jnp.dot(h.astype(w2_ref.dtype), w2_ref[...],
                preferred_element_type=jnp.float32)
    o_ref[...] = (y + b2_ref[...].astype(jnp.float32)).astype(o_ref.dtype)


def _mlp_kernel_tiled(x_ref, w1_ref, b1_ref, w2_ref, b2_ref, o_ref, acc_ref, *,
                      gelu_approx):
    """Hidden axis tiled as a reduction (grid axis 1, 'arbitrary', last)."""
    j = pl.program_id(1)

    @pl.when(j == 0)
    def _init():
        acc_ref[...] = jnp.zeros_like(acc_ref)

    h = jnp.dot(x_ref[...], w1_ref[...], preferred_element_type=jnp.float32)
    h = _gelu(h + b1_ref[...].astype(jnp.float32), gelu_approx)
    acc_ref[...] += jnp.dot(h.astype(w2_ref.dtype), w2_ref[...],
                            preferred_element_type=jnp.float32)

    @pl.when(j == pl.num_programs(1) - 1)
    def _finalize():
        o_ref[...] = (acc_ref[...] + b2_ref[...].astype(jnp.float32)
                      ).astype(o_ref.dtype)


# ---------------------------------------------------------------------------
# Tile / VMEM budgeting helpers
# ---------------------------------------------------------------------------

def _vmem_limit_bytes():
    """~80% of physical per-core VMEM (headroom for compiler scratch), capped.
    Conservative fallback equals v7x's 64 MiB physical if the query fails."""
    cap = 64 * 1024 * 1024
    try:
        info = pltpu.get_tpu_info()
        cap = int(getattr(info, "vmem_capacity_bytes", cap)) or cap
    except Exception:
        pass
    return min(int(cap * 0.8), 112 * 1024 * 1024)


def _vmem_estimate(tm, th, D, H, cdt_size, out_size, resident):
    """Rough per-step VMEM footprint (double-buffered pipeline blocks)."""
    dbl = 2
    b = dbl * tm * D * cdt_size            # x token tile
    b += dbl * 2 * D * th * cdt_size       # w1 + w2 slabs (2 buffers each)
    b += dbl * (th + D) * 4                # biases (f32)
    b += dbl * tm * D * out_size           # output tile
    b += tm * th * (4 + cdt_size)          # h intermediate (f32) + bf16 cast temp
    if not resident:
        b += tm * D * 4                    # f32 accumulator scratch
    return b


def _largest_aligned_divisor(total, upper, multiple):
    """Largest divisor of `total` that is <= `upper` and a multiple of
    `multiple`; falls back to `total` when no aligned divisor exists."""
    upper = min(upper, total)
    for cand in range(upper, multiple - 1, -1):
        if cand % multiple == 0 and total % cand == 0:
            return cand
    return total


# ---------------------------------------------------------------------------
# Public wrapper
# ---------------------------------------------------------------------------

@functools.partial(jax.jit,
                   static_argnames=("tm", "th", "compute_dtype", "gelu_approx"))
def mlp_pallas(x, w1, b1, w2, b2, *, tm=512, th=1024,
               compute_dtype=jnp.bfloat16, gelu_approx="tanh"):
    """x: (B, T, D); w1: (D, H); b1: (H,); w2: (H, D); b2: (D,).

    Weights are stored (in, out) (PyTorch stores (out, in) and does x @ w.T).
    """
    B, T, D = x.shape
    H = w1.shape[1]
    M = B * T
    out_dtype = x.dtype

    cdt = jnp.dtype(compute_dtype)
    x2 = x.reshape(M, D).astype(cdt)
    w1c = w1.astype(cdt)
    w2c = w2.astype(cdt)
    b1_2 = b1.reshape(1, H).astype(jnp.float32)
    b2_2 = b2.reshape(1, D).astype(jnp.float32)

    # --- token tile ---------------------------------------------------------
    tm = min(tm, M)
    if M >= 16:
        # Keep >= 2 token tiles so both v7x TensorCores get work.
        tm = min(tm, max(8, (M // 2) // 8 * 8))
    if M >= 8:
        tm = max(8, (tm // 8) * 8)

    vmem_limit = _vmem_limit_bytes()
    budget = int(vmem_limit * 0.85)
    tm_floor = min(128, tm)
    csz = cdt.itemsize
    osz = jnp.dtype(out_dtype).itemsize

    def shrink(t):
        return max(tm_floor, ((t // 2) // 8) * 8 if t >= 16 else tm_floor)

    # --- hidden tile: prefer fully-resident weights (th == H) ---------------
    t = tm
    while (_vmem_estimate(t, H, D, H, csz, osz, resident=True) > budget
           and t > tm_floor):
        t = shrink(t)
    resident = _vmem_estimate(t, H, D, H, csz, osz, resident=True) <= budget
    if resident:
        tm, th = t, H
    else:
        # Tile the hidden axis; th is a 128-aligned divisor of H, kept >= 512
        # so the accumulator RMW does not dominate the vst slot.
        th = _largest_aligned_divisor(H, max(512, min(th, H)), 128)
        t = tm
        while (_vmem_estimate(t, th, D, H, csz, osz, resident=False) > budget
               and t > tm_floor):
            t = shrink(t)
        tm = t
        # If this still exceeds the budget (extreme D), vmem_limit_bytes is the
        # final arbiter at compile time.

    n_token_tiles = pl.cdiv(M, tm)

    # --- honest cost estimate ------------------------------------------------
    weight_reads = 1 if resident else n_token_tiles
    flops = 4 * M * D * H                   # two matmuls, 2*M*D*H each
    transcendentals = M * H                 # one tanh/erf per hidden activation
    bytes_accessed = (x2.size * csz
                      + weight_reads * (w1c.size + w2c.size) * csz
                      + weight_reads * (b1_2.size + b2_2.size) * 4
                      + M * D * osz)
    cost = pl.CostEstimate(flops=flops, transcendentals=transcendentals,
                           bytes_accessed=bytes_accessed)

    if resident:
        grid = (n_token_tiles,)
        kernel = functools.partial(_mlp_kernel_resident, gelu_approx=gelu_approx)
        in_specs = [
            pl.BlockSpec((tm, D), lambda i: (i, 0)),   # x token tile
            # Constant index_maps: Pallas skips the re-DMA when the block index
            # is unchanged, so the weights stream from HBM exactly once.
            pl.BlockSpec((D, H), lambda i: (0, 0)),    # w1 (resident)
            pl.BlockSpec((1, H), lambda i: (0, 0)),    # b1 (resident)
            pl.BlockSpec((H, D), lambda i: (0, 0)),    # w2 (resident)
            pl.BlockSpec((1, D), lambda i: (0, 0)),    # b2 (resident)
        ]
        out_specs = pl.BlockSpec((tm, D), lambda i: (i, 0))
        scratch = []
        dim_sem = ("parallel",)
    else:
        grid = (n_token_tiles, H // th)
        kernel = functools.partial(_mlp_kernel_tiled, gelu_approx=gelu_approx)
        in_specs = [
            pl.BlockSpec((tm, D), lambda i, j: (i, 0)),   # x token tile
            pl.BlockSpec((D, th), lambda i, j: (0, j)),   # w1 hidden slab
            pl.BlockSpec((1, th), lambda i, j: (0, j)),   # b1 hidden slab
            pl.BlockSpec((th, D), lambda i, j: (j, 0)),   # w2 hidden slab
            pl.BlockSpec((1, D), lambda i, j: (0, 0)),    # b2
        ]
        out_specs = pl.BlockSpec((tm, D), lambda i, j: (i, 0))
        scratch = [pltpu.VMEM((tm, D), jnp.float32)]
        dim_sem = ("parallel", "arbitrary")

    out = pl.pallas_call(
        kernel,
        out_shape=jax.ShapeDtypeStruct((M, D), out_dtype),
        grid_spec=pltpu.PrefetchScalarGridSpec(
            num_scalar_prefetch=0,
            grid=grid,
            in_specs=in_specs,
            out_specs=out_specs,
            scratch_shapes=scratch,
        ),
        compiler_params=pltpu.CompilerParams(
            dimension_semantics=dim_sem,
            vmem_limit_bytes=vmem_limit,
        ),
        cost_estimate=cost,
    )(x2, w1c, b1_2, w2c, b2_2)

    return out.reshape(B, T, D)


def init_params(key, n_embd, dtype=jnp.float32):
    """Deterministic init mimicking nn.Linear default (uniform +/- 1/sqrt(fan_in))."""
    hidden = 4 * n_embd
    k1, k2, k3, k4 = jax.random.split(key, 4)
    lim1 = 1.0 / math.sqrt(n_embd)
    lim2 = 1.0 / math.sqrt(hidden)
    # Stored (in, out) so the kernel does x @ w (PyTorch stores (out, in), does x @ w.T).
    w1 = jax.random.uniform(k1, (n_embd, hidden), dtype, -lim1, lim1)
    b1 = jax.random.uniform(k2, (hidden,), dtype, -lim1, lim1)
    w2 = jax.random.uniform(k3, (hidden, n_embd), dtype, -lim2, lim2)
    b2 = jax.random.uniform(k4, (n_embd,), dtype, -lim2, lim2)
    return w1, b1, w2, b2


if __name__ == "__main__":
    # Small, tile-aligned shapes consistent with the module: (batch, seq, n_embd).
    B, T, n_embd = 2, 128, 128          # M = 256 tokens, hidden = 4*n_embd = 512
    key = jax.random.PRNGKey(0)
    kx, kp = jax.random.split(key)

    x = jax.random.normal(kx, (B, T, n_embd), jnp.float32)
    w1, b1, w2, b2 = init_params(kp, n_embd)

    out = mlp_pallas(x, w1, b1, w2, b2)
    out = jax.block_until_ready(out)

    # Reference 1: mirror the kernel's numerics (bf16 operands, f32 accumulate,
    # tanh GELU, bf16 cast of the hidden activation) -> tight tolerance.
    cdt = jnp.bfloat16
    xf = x.reshape(-1, n_embd).astype(cdt).astype(jnp.float32)
    w1f = w1.astype(cdt).astype(jnp.float32)
    w2f = w2.astype(cdt).astype(jnp.float32)
    h = xf @ w1f + b1.astype(jnp.float32)
    h = 0.5 * h * (1.0 + jnp.tanh(math.sqrt(2.0 / math.pi) * (h + 0.044715 * h ** 3)))
    h = h.astype(cdt).astype(jnp.float32)
    y_mirror = (h @ w2f + b2).reshape(B, T, n_embd).astype(x.dtype)
    assert jnp.allclose(out, y_mirror, atol=5e-3, rtol=5e-3), \
        "mismatch vs mirrored (bf16 / tanh-GELU) reference"

    # Reference 2: exact f32 / erf GELU (the PyTorch module's semantics) ->
    # loose tolerance covering bf16 + tanh-approximation error.
    h_ref = x.reshape(-1, n_embd) @ w1 + b1
    h_ref = 0.5 * h_ref * (1.0 + jax.lax.erf(h_ref / math.sqrt(2.0)))
    y_ref = (h_ref @ w2 + b2).reshape(B, T, n_embd)
    assert jnp.allclose(out, y_ref, atol=5e-2, rtol=5e-2), \
        "drift vs exact-erf f32 reference"

    print("KERNEL_OK")
</pallas_src>

<mosaic_0001>
module attributes {stable_mosaic.version = 11 : i64} {
  func.func @_mlp_kernel_resident(%arg0: i32, %arg1: memref<128x128xbf16, #tpu.memory_space<vmem>>, %arg2: memref<128x512xbf16, #tpu.memory_space<vmem>>, %arg3: memref<1x512xf32, #tpu.memory_space<vmem>>, %arg4: memref<512x128xbf16, #tpu.memory_space<vmem>>, %arg5: memref<1x128xf32, #tpu.memory_space<vmem>>, %arg6: memref<128x128xf32, #tpu.memory_space<vmem>>) attributes {dimension_semantics = [#tpu.dimension_semantics<parallel>], iteration_bounds = array<i64: 2>, scalar_prefetch = 0 : i64, scratch_operands = 0 : i64, tpu.core_type = #tpu.core_type<tc>, window_params = [{transform_indices = @transform_0, window_bounds = array<i64: 128, 128>}, {pipeline_mode = #tpu.pipeline_mode<synchronous>, transform_indices = @transform_1, window_bounds = array<i64: 128, 512>}, {pipeline_mode = #tpu.pipeline_mode<synchronous>, transform_indices = @transform_2, window_bounds = array<i64: 1, 512>}, {pipeline_mode = #tpu.pipeline_mode<synchronous>, transform_indices = @transform_3, window_bounds = array<i64: 512, 128>}, {pipeline_mode = #tpu.pipeline_mode<synchronous>, transform_indices = @transform_4, window_bounds = array<i64: 1, 128>}, {transform_indices = @transform_5, window_bounds = array<i64: 128, 128>}]} {
    %c0 = arith.constant 0 : index
    %c0_0 = arith.constant 0 : index
    %0 = vector.load %arg1[%c0, %c0_0] : memref<128x128xbf16, #tpu.memory_space<vmem>>, vector<128x128xbf16>
    %c0_1 = arith.constant 0 : index
    %c0_2 = arith.constant 0 : index
    %1 = vector.load %arg2[%c0_1, %c0_2] : memref<128x512xbf16, #tpu.memory_space<vmem>>, vector<128x512xbf16>
    %cst = arith.constant dense<0.000000e+00> : vector<128x512xf32>
    %2 = tpu.matmul %0, %1, %cst {dimension_numbers = #tpu.dot_dimension_numbers<[1], [0], [0], [1], [0, 0, 1, 1], [], []>} : vector<128x128xbf16>, vector<128x512xbf16>, vector<128x512xf32> -> vector<128x512xf32>
    %c0_3 = arith.constant 0 : index
    %c0_4 = arith.constant 0 : index
    %3 = vector.load %arg3[%c0_3, %c0_4] : memref<1x512xf32, #tpu.memory_space<vmem>>, vector<1x512xf32>
    %4 = vector.broadcast %3 : vector<1x512xf32> to vector<128x512xf32>
    %5 = arith.addf %2, %4 : vector<128x512xf32>
    %cst_5 = arith.constant 5.000000e-01 : f32
    %6 = vector.broadcast %cst_5 : f32 to vector<128x512xf32>
    %7 = arith.mulf %6, %5 : vector<128x512xf32>
    %cst_6 = arith.constant 4.471500e-02 : f32
    %8 = vector.broadcast %cst_6 : f32 to vector<128x512xf32>
    %9 = arith.mulf %8, %5 : vector<128x512xf32>
    %10 = arith.mulf %9, %5 : vector<128x512xf32>
    %11 = arith.mulf %10, %5 : vector<128x512xf32>
    %12 = arith.addf %5, %11 : vector<128x512xf32>
    %cst_7 = arith.constant 0.797884583 : f32
    %13 = vector.broadcast %cst_7 : f32 to vector<128x512xf32>
    %14 = arith.mulf %13, %12 : vector<128x512xf32>
    %15 = math.tanh %14 : vector<128x512xf32>
    %cst_8 = arith.constant 1.000000e+00 : f32
    %16 = vector.broadcast %cst_8 : f32 to vector<128x512xf32>
    %17 = arith.addf %16, %15 : vector<128x512xf32>
    %18 = arith.mulf %7, %17 : vector<128x512xf32>
    %19 = arith.truncf %18 : vector<128x512xf32> to vector<128x512xbf16>
    %c0_9 = arith.constant 0 : index
    %c0_10 = arith.constant 0 : index
    %20 = vector.load %arg4[%c0_9, %c0_10] : memref<512x128xbf16, #tpu.memory_space<vmem>>, vector<512x128xbf16>
    %cst_11 = arith.constant dense<0.000000e+00> : vector<128x128xf32>
    %21 = tpu.matmul %19, %20, %cst_11 {dimension_numbers = #tpu.dot_dimension_numbers<[1], [0], [0], [1], [0, 0, 1, 1], [], []>} : vector<128x512xbf16>, vector<512x128xbf16>, vector<128x128xf32> -> vector<128x128xf32>
    %c0_12 = arith.constant 0 : index
    %c0_13 = arith.constant 0 : index
    %22 = vector.load %arg5[%c0_12, %c0_13] : memref<1x128xf32, #tpu.memory_space<vmem>>, vector<1x128xf32>
    %23 = vector.broadcast %22 : vector<1x128xf32> to vector<128x128xf32>
    %24 = arith.addf %21, %23 : vector<128x128xf32>
    %c0_14 = arith.constant 0 : index
    %c0_15 = arith.constant 0 : index
    %25 = vector.load %arg6[%c0_14, %c0_15] : memref<128x128xf32, #tpu.memory_space<vmem>>, vector<128x128xf32>
    tpu.vector_store %arg6[%c0_14, %c0_15], %24 {strides = array<i32>} : memref<128x128xf32, #tpu.memory_space<vmem>>, vector<128x128xf32>,
    return
  }
  func.func @transform_0(%arg0: i32) -> (i32, i32) {
    %c0_i32 = arith.constant 0 : i32
    %c0_i32_0 = arith.constant 0 : i32
    return %arg0, %c0_i32 : i32, i32
  }
  func.func @transform_1(%arg0: i32) -> (i32, i32) {
    %c0_i32 = arith.constant 0 : i32
    %c0_i32_0 = arith.constant 0 : i32
    %c0_i32_1 = arith.constant 0 : i32
    return %c0_i32, %c0_i32_0 : i32, i32
  }
  func.func @transform_2(%arg0: i32) -> (i32, i32) {
    %c0_i32 = arith.constant 0 : i32
    %c0_i32_0 = arith.constant 0 : i32
    %c0_i32_1 = arith.constant 0 : i32
    return %c0_i32, %c0_i32_0 : i32, i32
  }
  func.func @transform_3(%arg0: i32) -> (i32, i32) {
    %c0_i32 = arith.constant 0 : i32
    %c0_i32_0 = arith.constant 0 : i32
    %c0_i32_1 = arith.constant 0 : i32
    return %c0_i32, %c0_i32_0 : i32, i32
  }
  func.func @transform_4(%arg0: i32) -> (i32, i32) {
    %c0_i32 = arith.constant 0 : i32
    %c0_i32_0 = arith.constant 0 : i32
    %c0_i32_1 = arith.constant 0 : i32
    return %c0_i32, %c0_i32_0 : i32, i32
  }
  func.func @transform_5(%arg0: i32) -> (i32, i32) {
    %c0_i32 = arith.constant 0 : i32
    %c0_i32_0 = arith.constant 0 : i32
    return %arg0, %c0_i32 : i32, i32
  }
}

</mosaic_0001>

<bundles_post_ra>
// kernel: mlp_pallas.1
= control target key start
LH: loop header
LB: loop body
LE: loop exit
PB: predicated region body
PF: predicated region fallthrough
CT: control target
= control target key end

     0   :  { %10 = vsyncpa [#allocation3], 0  ;;  %s3623_s0 = inlined_call_operand.vmem [shape: bf16[256,128], index: 0, kind: input, shape index: {}]   ;;  %s3624_s1 = inlined_call_operand.vmem [shape: bf16[128,512], index: 1, kind: input, shape index: {}]   ;;  %s3625_s2 = inlined_call_operand.vmem [shape: f32[1,512], index: 2, kind: input, shape index: {}]   ;;  %s3626_s3 = inlined_call_operand.vmem [shape: bf16[512,128], index: 3, kind: input, shape index: {}]   ;;  %s3627_s4 = inlined_call_operand.vmem [shape: f32[1,128], index: 4, kind: input, shape index: {}]   ;;  %s3628_s5 = inlined_call_operand.hbm [shape: f32[256,128], index: 5, kind: output, shape index: {}]  }
   0x1   :  { %12 = vsyncpa [#allocation3 + $0x1], 0  ;;  %s2458_s18 = smov 0   ;;  %s2460_s19 = smov 0  }
   0x2   :  { %s2462_s20 = smov 0   ;;  %s2464_s21 = smov 0  }
   0x3 LB: > { %s2479_s22 = sadd.s32 4294967295, %s2422_s21   ;;  %s1888_s23 = sadd.s32 4294967294, %s2422_s21   ;;  %s2422_s21 = sphi %s2464_s21, %s3840_s21   ;;  %s2418_s20 = sphi %s2462_s20, %s3839_s20   ;;  %s2414_s19 = sphi %s2460_s19, %s3838_s19   ;;  %s2410_s18 = sphi %s2458_s18, %s3837_s18  }
   0x4   : > { %s2483_s24 = sadd.s32 1, %s2422_s21   ;;  %s135_s25 = sadd.s32 1, %s2418_s20 }
   0x5   : > { %s132_s26 = ssub.s32 %s2422_s21, %s2483_s24  ;;  %p145_p0 = scmp.ne.s32.totalorder %s2418_s20, %s2414_s19 }
   0x6   : > { %p133_p1 = scmp.eq.s32.totalorder %s132_s26, 0  ;;  %p146_p2 = scmp.eq.s32.totalorder %s2479_s22, 1 }
   0x7   : > { %p151_p3 = scmp.ne.s32.totalorder %s2414_s19, %s2410_s18  ;;  %p152_p4 = scmp.eq.s32.totalorder %s1888_s23, 1 }
   0x8   : > { %s2494_s27 = scalar_select %p133_p1, %s2418_s20, %s135_s25  }
   0x9   : > { %p2496_p5 = por %p146_p2, %p145_p0  ;;  %p2500_p6 = por %p152_p4, %p151_p3 }
   0xa   : > { %p1891_p7 = scmp.ge.s32.totalorder %s2422_s21, 1  ;;  %p191_p8 = scmp.lt.s32.totalorder %s2422_s21, 3 }
   0xc   : > { %p192_p9 = pnand %p1891_p7, %p191_p8 }
   0xe   : > { %195 = sbr.rel (%p192_p9) target bundleno = 681 (0x2a9), region = 40 }
  0x15   : > { %v2144_v0 = vld [vmem:[%s3624_s1 + $0x4] ss:$16 sps:$4 sm:$0xff]   ;;  %v2146_v1 = vld [vmem:[%s3624_s1 + $0xc] ss:$16 sps:$4 sm:$0xff]   ;;  %v2424_v2 = vmov 0   ;;  %s1893_s7 = sshll.u32 %s2479_s22, 4 }
  0x16   : > { %537 = vmatprep.mubr.bf16.mxu0 %v2424_v2  ;;  %650 = vmatprep.mubr.bf16.mxu1 %v2424_v2  ;;  %v2148_v3 = vld [vmem:[%s3624_s1] ss:$16 sps:$4 sm:$0xff]   ;;  %v2149_v4 = vld [vmem:[%s3624_s1 + $0x8] ss:$16 sps:$4 sm:$0xff]   ;;  %v2150_v5 = vld [vmem:[%s3624_s1 + $0x24] ss:$16 sps:$4 sm:$0xff]  }
  0x17   : > { %505 = vmatprep.subr.bf16.mxu0 %v2144_v0  ;;  %618 = vmatprep.subr.bf16.mxu1 %v2146_v1  ;;  %v2152_v6 = vld [vmem:[%s3624_s1 + $0x2c] ss:$16 sps:$4 sm:$0xff]   ;;  %v2154_v7 = vld [vmem:[%s3624_s1 + $0x20] ss:$16 sps:$4 sm:$0xff]   ;;  %v2155_v8 = vld [vmem:[%s3624_s1 + $0x28] ss:$16 sps:$4 sm:$0xff]  }
  0x18   : > { %506 = vmatpush1.bf16.msra.mxu0 %v2148_v3  ;;  %619 = vmatpush1.bf16.msra.mxu1 %v2149_v4  ;;  %v2156_v9 = vld [vmem:[%s3624_s1 + $0x44] ss:$16 sps:$4 sm:$0xff]   ;;  %v2158_v10 = vld [vmem:[%s3624_s1 + $0x4c] ss:$16 sps:$4 sm:$0xff]   ;;  %v2160_v11 = vld [vmem:[%s3624_s1 + $0x40] ss:$16 sps:$4 sm:$0xff]  }
  0x19   : > { %507 = vmatprep.subr.bf16.mxu0 %v2150_v5  ;;  %620 = vmatprep.subr.bf16.mxu1 %v2152_v6  ;;  %v2161_v12 = vld [vmem:[%s3624_s1 + $0x48] ss:$16 sps:$4 sm:$0xff]   ;;  %v2162_v13 = vld [vmem:[%s3624_s1 + $0x64] ss:$16 sps:$4 sm:$0xff]   ;;  %v2164_v14 = vld [vmem:[%s3624_s1 + $0x6c] ss:$16 sps:$4 sm:$0xff]  }
  0x1a   : > { %p220_p10 = scmp.lt.s32.totalorder %s1893_s7, 31  ;;  %v2166_v15 = vld [vmem:[%s3624_s1 + $0x60] ss:$16 sps:$4 sm:$0xff]   ;;  %v2167_v16 = vld [vmem:[%s3624_s1 + $0x68] ss:$16 sps:$4 sm:$0xff]   ;;  %s216_s16 = sand.u32 1, %s2414_s19  }
  0x1b   : > { %v2168_v17 = vld [vmem:[%s3624_s1 + $0x84] ss:$16 sps:$4 sm:$0xff]   ;;  %v2170_v18 = vld [vmem:[%s3624_s1 + $0x8c] ss:$16 sps:$4 sm:$0xff]   ;;  %v2172_v19 = vld [vmem:[%s3624_s1 + $0x80] ss:$16 sps:$4 sm:$0xff]  }
  0x1c   : > { %508 = vmatpush1.bf16.msra.mxu0 %v2154_v7  ;;  %621 = vmatpush1.bf16.msra.mxu1 %v2155_v8  ;;  %s3842_s7 = smov (!%p220_p10, %s1893_s7), 31  ;;  %v2173_v20 = vld [vmem:[%s3624_s1 + $0x88] ss:$16 sps:$4 sm:$0xff]   ;;  %v2174_v21 = vld [vmem:[%s3624_s1 + $0xa4] ss:$16 sps:$4 sm:$0xff]   ;;  %s1892_s26 = sshll.u32 %s216_s16, 7 }
  0x1d   : > { %509 = vmatprep.subr.bf16.mxu0 %v2156_v9  ;;  %622 = vmatprep.subr.bf16.mxu1 %v2158_v10  ;;  %v2176_v22 = vld [vmem:[%s3624_s1 + $0xac] ss:$16 sps:$4 sm:$0xff]   ;;  %s1894_s25 = sshll.u32 %s3842_s7, 2  ;;  %v2178_v23 = vld [vmem:[%s3624_s1 + $0xa0] ss:$16 sps:$4 sm:$0xff]   ;;  %v277_v9 = vlaneseq  ;;  %s1973_s30 = sshll.u32 %s2479_s22, 11 }
  0x1e   : > { %v2179_v24 = vld [vmem:[%s3624_s1 + $0xa8] ss:$16 sps:$4 sm:$0xff]   ;;  %v2180_v25 = vld [vmem:[%s3624_s1 + $0xc4] ss:$16 sps:$4 sm:$0xff]   ;;  %s2587_s13 = scalar_lea.vmem %s3623_s0, %s1894_s25  ;;  %v2182_v26 = vld [vmem:[%s3624_s1 + $0xcc] ss:$16 sps:$4 sm:$0xff]   ;;  %s3574_s9 = scalar_lea.hbm %s3628_s5, %s1973_s30 }
  0x1f   : > { %v2184_v27 = vld [vmem:[%s3624_s1 + $0xc0] ss:$16 sps:$4 sm:$0xff]   ;;  %v2185_v28 = vld [vmem:[%s3624_s1 + $0xc8] ss:$16 sps:$4 sm:$0xff]   ;;  %v2186_v29 = vld [vmem:[%s3624_s1 + $0xe4] ss:$16 sps:$4 sm:$0xff]  }
  0x20   : > { %510 = vmatpush1.bf16.msra.mxu0 %v2160_v11  ;;  %623 = vmatpush1.bf16.msra.mxu1 %v2161_v12  ;;  %v2188_v30 = vld [vmem:[%s3624_s1 + $0xec] ss:$16 sps:$4 sm:$0xff]   ;;  %v2190_v31 = vld [vmem:[%s3624_s1 + $0xe0] ss:$16 sps:$4 sm:$0xff]   ;;  %v2191_v32 = vld [vmem:[%s3624_s1 + $0xe8] ss:$16 sps:$4 sm:$0xff]  }
  0x21   : > { %511 = vmatprep.subr.bf16.mxu0 %v2162_v13  ;;  %624 = vmatprep.subr.bf16.mxu1 %v2164_v14  ;;  %v2192_v33 = vld [vmem:[%s2587_s13] sm:$0xff]   ;;  %v2204_v38 = vld [vmem:[%s3626_s3 + $0x48] sm:$0xff]   ;;  %v2208_v43 = vld [vmem:[%s3626_s3 + $0x50] sm:$0xff]   ;;  %v278_v10 = vshrl.u32 %v277_v9, 7  ;;  %s3539_s25 = scalar_lea.vmem [#allocation2], %s1892_s26  ;;  %s3582_s10 = scalar_lea.sflag [#allocation3], %s216_s16 }
  0x22   : > { %v2200_v34 = vld [vmem:[%s3626_s3 + $0x40] sm:$0xff]   ;;  %v2205_v39 = vld [vmem:[%s3626_s3 + $0x8] sm:$0xff]   ;;  %v2209_v44 = vld [vmem:[%s3626_s3 + $0x10] sm:$0xff]   ;;  %s2425_s11 = smov [#allocation2]  }
  0x23   : > { %v2201_v35 = vld [vmem:[%s3626_s3] sm:$0xff]   ;;  %v2206_v40 = vld [vmem:[%s3626_s3 + $0xc8] sm:$0xff]   ;;  %v2210_v45 = vld [vmem:[%s3626_s3 + $0xd0] sm:$0xff]   ;;  %v279_v11 = vsub.s32 0, %v278_v10  ;;  %v287_v12 = vsub.s32 2, %v278_v10  ;;  %v283_v14 = vsub.s32 1, %v278_v10 }
  0x24   : > { %512 = vmatpush1.bf16.msra.mxu0 %v2166_v15  ;;  %625 = vmatpush1.bf16.msra.mxu1 %v2167_v16  ;;  %v2202_v36 = vld [vmem:[%s3626_s3 + $0xc0] sm:$0xff]   ;;  %v2193_v41 = vld [vmem:[%s2587_s13 + $0x8] sm:$0xff]   ;;  %v2211_v46 = vld [vmem:[%s3626_s3 + $0x90] sm:$0xff]   ;;  %v291_v15 = vsub.s32 3, %v278_v10  ;;  %s2364_s12 = sshll.u32 %s2425_s11, 4  ;;  %s2365_s12 = int_to_ptr.vmem [resolvable:$false] %s2364_s12 }
  0x25   : > { %513 = vmatprep.subr.bf16.mxu0 %v2168_v17  ;;  %626 = vmatprep.subr.bf16.mxu1 %v2170_v18  ;;  %v2203_v37 = vld [vmem:[%s3626_s3 + $0x80] sm:$0xff]   ;;  %v2207_v42 = vld [vmem:[%s3626_s3 + $0x88] sm:$0xff]   ;;  %v2212_v47 = vld [vmem:[%s3626_s3 + $0x58] sm:$0xff]   ;;  %s2366_s7 = scalar_lea.vmem %s2365_s12, 4096 }
  0x26   : > { %v2214_v48 = vld [vmem:[%s3626_s3 + $0xd8] sm:$0xff]   ;;  %v2194_v49 = vld [vmem:[%s2587_s13 + $0x10] sm:$0xff]   ;;  %v2196_v53 = vld [vmem:[%s2587_s13 + $0x20] sm:$0xff]  }
  0x27   : > { %v2213_v50 = vld [vmem:[%s3626_s3 + $0x18] sm:$0xff]   ;;  %v2197_v54 = vld [vmem:[%s2587_s13 + $0x28] sm:$0xff]   ;;  %v2198_v55 = vld [vmem:[%s2587_s13 + $0x30] sm:$0xff]  }
  0x28   : > { %514 = vmatpush1.bf16.msra.mxu0 %v2172_v19  ;;  %627 = vmatpush1.bf16.msra.mxu1 %v2173_v20  ;;  %v2215_v51 = vld [vmem:[%s3626_s3 + $0x98] sm:$0xff]   ;;  %v2216_v57 = vld [vmem:[%s3626_s3 + $0x60] sm:$0xff]   ;;  %v2220_v61 = vld [vmem:[%s3626_s3 + $0x68] sm:$0xff]  }
  0x29   : > { %515 = vmatprep.subr.bf16.mxu0 %v2174_v21  ;;  %628 = vmatprep.subr.bf16.mxu1 %v2176_v22  ;;  %v2195_v52 = vld [vmem:[%s2587_s13 + $0x18] sm:$0xff]   ;;  %v2217_v58 = vld [vmem:[%s3626_s3 + $0x20] sm:$0xff]   ;;  %v2221_v62 = vld [vmem:[%s3626_s3 + $0x28] sm:$0xff]  }
  0x2a   : > { %v2199_v56 = vld [vmem:[%s2587_s13 + $0x38] sm:$0xff]   ;;  %v2218_v59 = vld [vmem:[%s3626_s3 + $0xe0] sm:$0xff]   ;;  %v2222_v63 = vld [vmem:[%s3626_s3 + $0xe8] sm:$0xff]   ;;  %s1826_s13 = sshll.u32 %s3539_s25, 4  ;;  %s3576_s13 = int_to_ptr.vmem [resolvable:$true] %s1826_s13 }
  0x2b   : > { %v2219_v60 = vld [vmem:[%s3626_s3 + $0xa0] sm:$0xff]   ;;  %v2223_v0 = vld [vmem:[%s3626_s3 + $0xa8] sm:$0xff]   ;;  %v2224_v1 = vld [vmem:[%s3626_s3 + $0x70] sm:$0xff]   ;;  %s2360_s22 = scalar_lea.vmem %s3576_s13, 2048  ;;  %p2367_p0 = scmp.lt.s32.totalorder %s3576_s13, %s2365_s12 }
  0x2c   : > { %516 = vmatpush1.bf16.msra.mxu0 %v2178_v23  ;;  %629 = vmatpush1.bf16.msra.mxu1 %v2179_v24  ;;  %v2226_v3 = vld [vmem:[%s3626_s3 + $0xf0] sm:$0xff]   ;;  %v2228_v5 = vld [vmem:[%s3626_s3 + $0x78] sm:$0xff]   ;;  %v275_v13 = vld [vmem:[%s3625_s2] sm:$0xf]  ;;  %p2361_p11 = scmp.ne.s32.totalorder %s3576_s13, %s2360_s22  ;;  %p2368_p1 = scmp.lt.s32.totalorder %s2366_s7, %s2360_s22 }
  0x2d   : > { %517 = vmatprep.subr.bf16.mxu0 %v2180_v25  ;;  %630 = vmatprep.subr.bf16.mxu1 %v2182_v26  ;;  %v2227_v4 = vld [vmem:[%s3626_s3 + $0xb0] sm:$0xff]   ;;  %v2230_v6 = vld [vmem:[%s3626_s3 + $0xf8] sm:$0xff]   ;;  %v2731_v16 = vrot.slane %v275_v13, %v279_v11  ;;  %v2733_v17 = vrot.slane %v275_v13, %v287_v12  ;;  %v2735_v18 = vrot.slane %v275_v13, %v283_v14 }
  0x2e   : > { %v2229_v7 = vld [vmem:[%s3626_s3 + $0x38] sm:$0xff]   ;;  %v2737_v19 = vrot.slane %v275_v13, %v291_v15  ;;  %p2362_p12 = pnand %p2361_p11, %p2496_p5  ;;  %p2369_p2 = por %p2368_p1, %p2367_p0 }
  0x2f   : > { %v2231_v8 = vld [vmem:[%s3626_s3 + $0xb8] sm:$0xff]  }
  0x30   : > { %518 = vmatpush1.bf16.msra.mxu0 %v2184_v27  ;;  %631 = vmatpush1.bf16.msra.mxu1 %v2185_v28  ;;  %p2363_p13 = pneg %p2362_p12 }
  0x31   : > { %519 = vmatprep.subr.bf16.mxu0 %v2186_v29  ;;  %632 = vmatprep.subr.bf16.mxu1 %v2188_v30 }
  0x32   : > { %p2370_p3 = pnand %p2369_p2, %p2363_p13 }
  0x34   : > { %520 = vmatpush1.bf16.msra.mxu0 %v2190_v31  ;;  %633 = vmatpush1.bf16.msra.mxu1 %v2191_v32 }
  0x35   : > { %1974 = vmatprep.subr.bf16.mxu0 %v2200_v34  ;;  %2038 = vmatprep.subr.bf16.mxu1 %v2202_v36 }
  0x37   : > { %538 = vmatmul.mubr.bf16.vlgmr.msra.gmra.mrb[0].mxu0 %v2192_v33  ;;  %651 = vmatmul.mubr.bf16.vlgmr.msra.gmra.mrb[0].mxu1 %v2192_v33 }
  0x38   : > { %547 = vmatprep.mubr.bf16.mxu0 %v2424_v2  ;;  %660 = vmatprep.mubr.bf16.mxu1 %v2424_v2 }
  0x39   : > { %1975 = vmatpush3.bf16.msra.mxu0 %v2201_v35  ;;  %2039 = vmatpush3.bf16.msra.mxu1 %v2203_v37 }
  0x3a   : > { %1976 = vmatprep.subr.bf16.mxu0 %v2204_v38  ;;  %2040 = vmatprep.subr.bf16.mxu1 %v2206_v40 }
  0x3d   : > { %1977 = vmatpush3.bf16.msra.mxu0 %v2205_v39  ;;  %2041 = vmatpush3.bf16.msra.mxu1 %v2207_v42 }
  0x3e   : > { %1978 = vmatprep.subr.bf16.mxu0 %v2208_v43  ;;  %2042 = vmatprep.subr.bf16.mxu1 %v2210_v45 }
  0x3f   : > { %548 = vmatmul.mubr.bf16.gmra.mrb[4].mxu0 %v2193_v41  ;;  %661 = vmatmul.mubr.bf16.gmra.mrb[4].mxu1 %v2193_v41 }
  0x40   : > { %557 = vmatprep.mubr.bf16.mxu0 %v2424_v2  ;;  %670 = vmatprep.mubr.bf16.mxu1 %v2424_v2 }
  0x41   : > { %1979 = vmatpush3.bf16.msra.mxu0 %v2209_v44  ;;  %2043 = vmatpush3.bf16.msra.mxu1 %v2211_v46 }
  0x42   : > { %1980 = vmatprep.subr.bf16.mxu0 %v2212_v47  ;;  %2044 = vmatprep.subr.bf16.mxu1 %v2214_v48 }
  0x45   : > { %1981 = vmatpush3.bf16.msra.mxu0 %v2213_v50  ;;  %2045 = vmatpush3.bf16.msra.mxu1 %v2215_v51 }
  0x46   : > { %1982 = vmatprep.subr.bf16.mxu0 %v2216_v57  ;;  %2046 = vmatprep.subr.bf16.mxu1 %v2218_v59 }
  0x47   : > { %558 = vmatmul.mubr.bf16.gmra.mrb[8].mxu0 %v2194_v49  ;;  %671 = vmatmul.mubr.bf16.gmra.mrb[8].mxu1 %v2194_v49 }
  0x48   : > { %567 = vmatprep.mubr.bf16.mxu0 %v2424_v2  ;;  %680 = vmatprep.mubr.bf16.mxu1 %v2424_v2 }
  0x49   : > { %1983 = vmatpush3.bf16.msra.mxu0 %v2217_v58  ;;  %2047 = vmatpush3.bf16.msra.mxu1 %v2219_v60 }
  0x4a   : > { %1984 = vmatprep.subr.bf16.mxu0 %v2220_v61  ;;  %2048 = vmatprep.subr.bf16.mxu1 %v2222_v63 }
  0x4d   : > { %1985 = vmatpush3.bf16.msra.mxu0 %v2221_v62  ;;  %2049 = vmatpush3.bf16.msra.mxu1 %v2223_v0 }
  0x4e   : > { %1986 = vmatprep.subr.bf16.mxu0 %v2224_v1  ;;  %2050 = vmatprep.subr.bf16.mxu1 %v2226_v3 }
  0x4f   : > { %568 = vmatmul.mubr.bf16.gmra.mrb[12].mxu0 %v2195_v52  ;;  %681 = vmatmul.mubr.bf16.gmra.mrb[12].mxu1 %v2195_v52 }
  0x50   : > { %577 = vmatprep.mubr.bf16.mxu0 %v2424_v2  ;;  %690 = vmatprep.mubr.bf16.mxu1 %v2424_v2 }
  0x51   : > { %2051 = vmatpush3.bf16.msra.mxu1 %v2227_v4 }
  0x52   : > { %2052 = vmatprep.subr.bf16.mxu1 %v2230_v6 }
  0x55   : > { %2053 = vmatpush3.bf16.msra.mxu1 %v2231_v8 }
  0x57   : > { %578 = vmatmul.mubr.bf16.gmra.mrb[16].mxu0 %v2196_v53  ;;  %691 = vmatmul.mubr.bf16.gmra.mrb[16].mxu1 %v2196_v53 }
  0x58   : > { %587 = vmatprep.mubr.bf16.mxu0 %v2424_v2  ;;  %700 = vmatprep.mubr.bf16.mxu1 %v2424_v2 }
  0x5f   : > { %588 = vmatmul.mubr.bf16.gmra.mrb[20].mxu0 %v2197_v54  ;;  %701 = vmatmul.mubr.bf16.gmra.mrb[20].mxu1 %v2197_v54 }
  0x60   : > { %597 = vmatprep.mubr.bf16.mxu0 %v2424_v2  ;;  %710 = vmatprep.mubr.bf16.mxu1 %v2424_v2 }
  0x67   : > { %598 = vmatmul.mubr.bf16.gmra.mrb[24].mxu0 %v2198_v55  ;;  %711 = vmatmul.mubr.bf16.gmra.mrb[24].mxu1 %v2198_v55 }
  0x68   : > { %607 = vmatprep.mubr.bf16.mxu0 %v2424_v2  ;;  %720 = vmatprep.mubr.bf16.mxu1 %v2424_v2  ;;  %v2225_v2 = vld [vmem:[%s3626_s3 + $0x30] sm:$0xff]  }
  0x69   : > { %1987 = vmatpush3.bf16.msra.mxu0 %v2225_v2 }
  0x6a   : > { %1988 = vmatprep.subr.bf16.mxu0 %v2228_v5 }
  0x6d   : > { %1989 = vmatpush3.bf16.msra.mxu0 %v2229_v7 }
  0x6f   : > { %608 = vmatmul.mubr.bf16.gmra.mrb[28].mxu0 %v2199_v56  ;;  %721 = vmatmul.mubr.bf16.gmra.mrb[28].mxu1 %v2199_v56 }
 0x10a   : > { %v539_v20 = vpop.f32.mrb[0].mxu0  ;;  %v652_v21 = vpop.f32.mrb[0].mxu1 }
 0x10b   : > { %v540_v22 = vadd.f32 %v539_v20, %v2731_v16  ;;  %v653_v23 = vadd.f32 %v652_v21, %v2733_v17  ;;  %v541_v24 = vpop.f32.mrb[1].mxu0  ;;  %v654_v25 = vpop.f32.mrb[1].mxu1 }
 0x10c   : > { %v2742_v26 = vadd.f32 %v541_v24, %v2735_v18  ;;  %v2745_v27 = vadd.f32 %v654_v25, %v2737_v19  ;;  %v543_v28 = vpop.f32.mrb[2].mxu0  ;;  %v656_v29 = vpop.f32.mrb[2].mxu1 }
 0x10d   : > { %v795_v30 = vmul.f32 0.044715, %v540_v22  ;;  %v797_v31 = vmul.f32 0.044715, %v653_v23  ;;  %v544_v32 = vadd.f32 %v543_v28, %v2731_v16  ;;  %v657_v33 = vadd.f32 %v656_v29, %v2733_v17  ;;  %v545_v34 = vpop.f32.mrb[3].mxu0  ;;  %v658_v35 = vpop.f32.mrb[3].mxu1 }
 0x10e   : > { %v796_v38 = vmul.f32 0.044715, %v2742_v26  ;;  %v798_v39 = vmul.f32 0.044715, %v2745_v27  ;;  %v2752_v44 = vadd.f32 %v545_v34, %v2735_v18  ;;  %v2755_v46 = vadd.f32 %v658_v35, %v2737_v19 }
 0x10f   : > { %v859_v36 = vmul.f32 %v795_v30, %v540_v22  ;;  %v861_v37 = vmul.f32 %v797_v31, %v653_v23  ;;  %v799_v40 = vmul.f32 0.044715, %v544_v32  ;;  %v801_v43 = vmul.f32 0.044715, %v657_v33 }
 0x110   : > { %v860_v50 = vmul.f32 %v796_v38, %v2742_v26  ;;  %v862_v54 = vmul.f32 %v798_v39, %v2745_v27  ;;  %v2765_v60 = vmul.f32 0.5, %v540_v22  ;;  %v800_v63 = vmul.f32 0.044715, %v2752_v44 }
 0x111   : > { %v923_v41 = vmul.f32 %v859_v36, %v540_v22  ;;  %v925_v42 = vmul.f32 %v861_v37, %v653_v23  ;;  %v863_v45 = vmul.f32 %v799_v40, %v544_v32  ;;  %v865_v51 = vmul.f32 %v801_v43, %v657_v33 }
 0x112   : > { %v549_v47 = vpop.f32.mrb[4].mxu0  ;;  %v662_v48 = vpop.f32.mrb[4].mxu1  ;;  %v2768_v3 = vmul.f32 0.5, %v653_v23  ;;  %v802_v5 = vmul.f32 0.044715, %v2755_v46  ;;  %v2777_v10 = vmul.f32 %v860_v50, %v2742_v26  ;;  %v2780_v11 = vmul.f32 %v862_v54, %v2745_v27 }
 0x113   : > { %v987_v49 = vadd.f32 %v923_v41, %v540_v22  ;;  %v551_v52 = vpop.f32.mrb[5].mxu0  ;;  %v664_v53 = vpop.f32.mrb[5].mxu1  ;;  %v927_v55 = vmul.f32 %v863_v45, %v544_v32  ;;  %v2760_v56 = vadd.f32 %v549_v47, %v2731_v16  ;;  %v2763_v57 = vadd.f32 %v662_v48, %v2733_v17 }
 0x114   : > { %v553_v58 = vpop.f32.mrb[6].mxu0  ;;  %v666_v59 = vpop.f32.mrb[6].mxu1  ;;  %v989_v61 = vadd.f32 %v925_v42, %v653_v23  ;;  %v929_v62 = vmul.f32 %v865_v51, %v657_v33  ;;  %v2774_v9 = vadd.f32 %v551_v52, %v2735_v18  ;;  %v2782_v12 = vmul.f32 0.5, %v544_v32 }
 0x115   : > { %3693 = vst [vmem:[#allocation5_spill] sm:$0xff] %v2760_v56  ;;  %3694 = vst [vmem:[#allocation6_spill] sm:$0xff] %v2763_v57  ;;  %v555_v0 = vpop.f32.mrb[7].mxu0  ;;  %v668_v1 = vpop.f32.mrb[7].mxu1  ;;  %v1051_v2 = vmul.f32 0.7978846, %v987_v49  ;;  %v991_v4 = vadd.f32 %v927_v55, %v544_v32  ;;  %v864_v15 = vmul.f32 %v800_v63, %v2752_v44  ;;  %v2788_v20 = vadd.f32 %v664_v53, %v2737_v19 }
 0x116   : > { %v993_v6 = vadd.f32 %v929_v62, %v657_v33  ;;  %v803_v7 = vmul.f32 0.044715, %v2760_v56  ;;  %v805_v8 = vmul.f32 0.044715, %v2763_v57  ;;  %v2784_v13 = vmul.f32 0.5, %v657_v33 }
 0x117   : > { %v1053_v14 = vmul.f32 0.7978846, %v989_v61  ;;  %3695 = vst [vmem:[#allocation7_spill] sm:$0xff] %v2788_v20  ;;  %v2791_v21 = vadd.f32 %v553_v58, %v2731_v16  ;;  %v1055_v22 = vmul.f32 0.7978846, %v991_v4  ;;  %v866_v23 = vmul.f32 %v802_v5, %v2755_v46 }
 0x118   : > { %v804_v24 = vmul.f32 0.044715, %v2774_v9  ;;  %v2796_v25 = vadd.f32 %v666_v59, %v2733_v17  ;;  %2232 = vtanh.f32 %v1051_v2  ;;  %v1057_v30 = vmul.f32 0.7978846, %v993_v6 }
 0x119   : > { %3696 = vst [vmem:[#allocation8_spill] sm:$0xff] %v2791_v21  ;;  %v867_v31 = vmul.f32 %v803_v7, %v2760_v56  ;;  %v869_v32 = vmul.f32 %v805_v8, %v2763_v57  ;;  %v806_v35 = vmul.f32 0.044715, %v2788_v20  ;;  %v2802_v36 = vadd.f32 %v555_v0, %v2735_v18 }
 0x11a   : > { %3697 = vst [vmem:[#allocation9_spill] sm:$0xff] %v2796_v25  ;;  %v559_v28 = vpop.f32.mrb[8].mxu0  ;;  %v672_v29 = vpop.f32.mrb[8].mxu1  ;;  %v2805_v37 = vadd.f32 %v668_v1, %v2737_v19  ;;  %2234 = vtanh.f32 %v1053_v14  ;;  %v807_v41 = vmul.f32 0.044715, %v2791_v21  ;;  %v2816_v48 = vmul.f32 %v864_v15, %v2752_v44 }
 0x11b   : > { %v561_v33 = vpop.f32.mrb[9].mxu0  ;;  %v674_v34 = vpop.f32.mrb[9].mxu1  ;;  %v2808_v38 = vadd.f32 %v559_v28, %v2731_v16  ;;  %v809_v42 = vmul.f32 0.044715, %v2796_v25  ;;  %v2813_v43 = vadd.f32 %v672_v29, %v2733_v17  ;;  %2236 = vtanh.f32 %v1055_v22 }
 0x11c   : > { %3698 = vst [vmem:[#allocation10_spill] sm:$0xff] %v2805_v37  ;;  %v563_v39 = vpop.f32.mrb[10].mxu0  ;;  %v676_v40 = vpop.f32.mrb[10].mxu1  ;;  %v868_v49 = vmul.f32 %v804_v24, %v2774_v9  ;;  %v808_v50 = vmul.f32 0.044715, %v2802_v36  ;;  %v2824_v54 = vadd.f32 %v561_v33, %v2735_v18  ;;  %2238 = vtanh.f32 %v1057_v30 }
 0x11d   : > { %3699 = vst [vmem:[#allocation11_spill] sm:$0xff] %v2808_v38  ;;  %3700 = vst [vmem:[#allocation12_spill] sm:$0xff] %v2813_v43  ;;  %v565_v45 = vpop.f32.mrb[11].mxu0  ;;  %v678_v47 = vpop.f32.mrb[11].mxu1  ;;  %v810_v51 = vmul.f32 0.044715, %v2805_v37  ;;  %v2827_v55 = vmul.f32 %v866_v23, %v2755_v46  ;;  %v2830_v58 = vmul.f32 %v867_v31, %v2760_v56  ;;  %v2833_v59 = vmul.f32 %v869_v32, %v2763_v57 }
 0x11e   : > { %v811_v52 = vmul.f32 0.044715, %v2808_v38  ;;  %v813_v53 = vmul.f32 0.044715, %v2813_v43  ;;  %3701 = vst [vmem:[#allocation13_spill] sm:$0xff] %v2824_v54  ;;  %v870_v61 = vmul.f32 %v806_v35, %v2788_v20  ;;  %v871_v62 = vmul.f32 %v807_v41, %v2791_v21 }
 0x11f   : > { %3702 = vst [vmem:[#allocation14_spill] sm:$0xff] %v2830_v58  ;;  %3703 = vst [vmem:[#allocation15_spill] sm:$0xff] %v2833_v59  ;;  %v873_v63 = vmul.f32 %v809_v42, %v2796_v25  ;;  %v812_v0 = vmul.f32 0.044715, %v2824_v54  ;;  %v872_v1 = vmul.f32 %v808_v50, %v2802_v36  ;;  %v2841_v2 = vadd.f32 %v674_v34, %v2737_v19 }
 0x120   : > { %v2844_v4 = vadd.f32 %v563_v39, %v2731_v16  ;;  %v2847_v5 = vadd.f32 %v676_v40, %v2733_v17  ;;  %v2850_v8 = vmul.f32 %v868_v49, %v2774_v9  ;;  %v874_v14 = vmul.f32 %v810_v51, %v2805_v37 }
 0x121   : > { %3704 = vst [vmem:[#allocation16_spill] sm:$0xff] %v2841_v2  ;;  %v875_v15 = vmul.f32 %v811_v52, %v2808_v38  ;;  %v877_v22 = vmul.f32 %v813_v53, %v2813_v43  ;;  %v876_v28 = vmul.f32 %v812_v0, %v2824_v54  ;;  %v2857_v29 = vadd.f32 %v565_v45, %v2735_v18 }
 0x122   : > { %v569_v6 = vpop.f32.mrb[12].mxu0  ;;  %v682_v7 = vpop.f32.mrb[12].mxu1  ;;  %v2860_v30 = vadd.f32 %v678_v47, %v2737_v19  ;;  %v2868_v35 = vmul.f32 %v870_v61, %v2788_v20  ;;  %v2871_v39 = vmul.f32 %v871_v62, %v2791_v21  ;;  %v2874_v40 = vmul.f32 %v873_v63, %v2796_v25 }
 0x123   : > { %v571_v23 = vpop.f32.mrb[13].mxu0  ;;  %v684_v24 = vpop.f32.mrb[13].mxu1  ;;  %v2863_v31 = vadd.f32 %v569_v6, %v2731_v16  ;;  %v2877_v41 = vadd.f32 %v682_v7, %v2733_v17  ;;  %v2880_v47 = vmul.f32 %v872_v1, %v2802_v36  ;;  %v814_v49 = vmul.f32 0.044715, %v2841_v2 }
 0x124   : > { %v573_v32 = vpop.f32.mrb[14].mxu0  ;;  %v686_v33 = vpop.f32.mrb[14].mxu1  ;;  %3706 = vst [vmem:[#allocation18_spill] sm:$0xff] %v2868_v35  ;;  %3707 = vst [vmem:[#allocation19_spill] sm:$0xff] %v2871_v39  ;;  %v815_v50 = vmul.f32 0.044715, %v2844_v4  ;;  %v2888_v53 = vmul.f32 %v874_v14, %v2805_v37  ;;  %v2893_v63 = vadd.f32 %v571_v23, %v2735_v18  ;;  %v2898_v1 = vmul.f32 %v875_v15, %v2808_v38 }
 0x125   : > { %3705 = vst [vmem:[#allocation17_spill] sm:$0xff] %v2863_v31  ;;  %v2865_v34 = vpop.eup %2232  ;;  %3708 = vst [vmem:[#allocation20_spill] sm:$0xff] %v2874_v40  ;;  %v575_v42 = vpop.f32.mrb[15].mxu0  ;;  %v817_v51 = vmul.f32 0.044715, %v2847_v5  ;;  %v2901_v6 = vmul.f32 %v877_v22, %v2813_v43  ;;  %v2904_v7 = vmul.f32 %v876_v28, %v2824_v54  ;;  %v2910_v23 = vadd.f32 %v684_v24, %v2737_v19 }
 0x126   : > { %3709 = vst [vmem:[#allocation21_spill] sm:$0xff] %v2877_v41  ;;  %v688_v45 = vpop.f32.mrb[15].mxu1  ;;  %3710 = vst [vmem:[#allocation22_spill] sm:$0xff] %v2880_v47  ;;  %v2885_v52 = vpop.eup %2234  ;;  %v816_v61 = vmul.f32 0.044715, %v2857_v29  ;;  %v2913_v59 = vadd.f32 %v573_v32, %v2731_v16  ;;  %v878_v22 = vmul.f32 %v814_v49, %v2841_v2  ;;  %v2921_v43 = vadd.f32 %v686_v33, %v2733_v17 }
 0x127   : > { %3711 = vst [vmem:[#allocation23_spill] sm:$0xff] %v2888_v53  ;;  %v818_v62 = vmul.f32 0.044715, %v2860_v30  ;;  %3712 = vst [vmem:[#allocation24_spill] sm:$0xff] %v2893_v63  ;;  %v2895_v0 = vpop.eup %2236  ;;  %v819_v14 = vmul.f32 0.044715, %v2863_v31  ;;  %v881_v28 = vmul.f32 %v817_v51, %v2847_v5  ;;  %v2932_v33 = vadd.f32 %v688_v45, %v2737_v19 }
 0x128   : > { %3713 = vst [vmem:[#allocation25_spill] sm:$0xff] %v2898_v1  ;;  %3714 = vst [vmem:[#allocation26_spill] sm:$0xff] %v2901_v6  ;;  %v821_v40 = vmul.f32 0.044715, %v2877_v41  ;;  %v820_v25 = vmul.f32 0.044715, %v2893_v63  ;;  %v2915_v15 = vpop.eup %2238  ;;  %v879_v6 = vmul.f32 %v815_v50, %v2844_v4  ;;  %v2929_v50 = vadd.f32 %v575_v42, %v2735_v18 }
 0x129   : > { %3715 = vst [vmem:[#allocation27_spill] sm:$0xff] %v2904_v7  ;;  %3716 = vst [vmem:[#allocation28_spill] sm:$0xff] %v2910_v23  ;;  %v880_v7 = vmul.f32 %v816_v61, %v2857_v29  ;;  %v882_v24 = vmul.f32 %v818_v62, %v2860_v30  ;;  %v822_v32 = vmul.f32 0.044715, %v2910_v23  ;;  %v823_v54 = vmul.f32 0.044715, %v2913_v59 }
 0x12a   : > { %3717 = vst [vmem:[#allocation29_spill] sm:$0xff] %v2913_v59  ;;  %3718 = vst [vmem:[#allocation30_spill] sm:$0xff] %v2921_v43  ;;  %v579_v1 = vpop.f32.mrb[16].mxu0  ;;  %v692_v38 = vpop.f32.mrb[16].mxu1  ;;  %v825_v49 = vmul.f32 0.044715, %v2921_v43  ;;  %v883_v62 = vmul.f32 %v819_v14, %v2863_v31  ;;  %v885_v58 = vmul.f32 %v821_v40, %v2877_v41  ;;  %v884_v56 = vmul.f32 %v820_v25, %v2893_v63 }
 0x12b   : > { %v581_v57 = vpop.f32.mrb[17].mxu0  ;;  %v694_v39 = vpop.f32.mrb[17].mxu1  ;;  %3719 = vst [vmem:[#allocation31_spill] sm:$0xff] %v2929_v50  ;;  %3720 = vst [vmem:[#allocation32_spill] sm:$0xff] %v2932_v33  ;;  %v2935_v51 = vadd.f32 %v579_v1, %v2731_v16  ;;  %v2941_v53 = vadd.f32 %v692_v38, %v2733_v17  ;;  %v886_v45 = vmul.f32 %v822_v32, %v2910_v23  ;;  %v824_v20 = vmul.f32 0.044715, %v2929_v50 }
 0x12c   : > { %v583_v61 = vpop.f32.mrb[18].mxu0  ;;  %v696_v21 = vpop.f32.mrb[18].mxu1  ;;  %v887_v1 = vmul.f32 %v823_v54, %v2913_v59  ;;  %v889_v35 = vmul.f32 %v825_v49, %v2921_v43  ;;  %v2952_v14 = vmul.f32 %v878_v22, %v2841_v2  ;;  %v826_v25 = vmul.f32 0.044715, %v2932_v33 }
 0x12d   : > { %3721 = vst [vmem:[#allocation33_spill] sm:$0xff] %v2935_v51  ;;  %3722 = vst [vmem:[#allocation34_spill] sm:$0xff] %v2941_v53  ;;  %v2943_v37 = vpop.f32.mrb[19].mxu0  ;;  %v2945_v42 = vpop.f32.mrb[19].mxu1  ;;  %v827_v38 = vmul.f32 0.044715, %v2935_v51  ;;  %v2958_v47 = vmul.f32 %v879_v6, %v2844_v4  ;;  %v2961_v32 = vmul.f32 %v881_v28, %v2847_v5  ;;  %v2964_v54 = vmul.f32 %v880_v7, %v2857_v29 }
 0x12e   : > { %3723 = vst [vmem:[#allocation35_spill] sm:$0xff] %v2952_v14  ;;  %v829_v40 = vmul.f32 0.044715, %v2941_v53  ;;  %v2967_v49 = vadd.f32 %v581_v57, %v2735_v18  ;;  %v2970_v22 = vmul.f32 %v882_v24, %v2860_v30  ;;  %v2973_v14 = vmul.f32 %v883_v62, %v2863_v31 }
 0x12f   : > { %3724 = vst [vmem:[#allocation36_spill] sm:$0xff] %v2961_v32  ;;  %v2976_v2 = vmul.f32 %v885_v58, %v2877_v41  ;;  %v888_v6 = vmul.f32 %v824_v20, %v2929_v50  ;;  %v2980_v28 = vmul.f32 %v884_v56, %v2893_v63  ;;  %v2983_v7 = vmul.f32 %v886_v45, %v2910_v23 }
 0x130   : > { %3725 = vst [vmem:[#allocation37_spill] sm:$0xff] %v2967_v49  ;;  %3726 = vst [vmem:[#allocation38_spill] sm:$0xff] %v2973_v14  ;;  %v2986_v57 = vmul.f32 %v887_v1, %v2913_v59  ;;  %v2989_v24 = vmul.f32 %v889_v35, %v2921_v43  ;;  %v890_v14 = vmul.f32 %v826_v25, %v2932_v33  ;;  %v828_v1 = vmul.f32 0.044715, %v2967_v49 }
 0x131   : > { %3727 = vst [vmem:[#allocation39_spill] sm:$0xff] %v2976_v2  ;;  %3728 = vst [vmem:[#allocation40_spill] sm:$0xff] %v2980_v28  ;;  %v891_v58 = vmul.f32 %v827_v38, %v2935_v51  ;;  %v893_v20 = vmul.f32 %v829_v40, %v2941_v53  ;;  %v988_v56 = vadd.f32 %v2777_v10, %v2742_v26 }
 0x132   : > { %3729 = vst [vmem:[#allocation41_spill] sm:$0xff] %v2983_v7  ;;  %3730 = vst [vmem:[#allocation42_spill] sm:$0xff] %v2986_v57  ;;  %v589_v32 = vpop.f32.mrb[20].mxu0  ;;  %v702_v62 = vpop.f32.mrb[20].mxu1  ;;  %v3000_v41 = vadd.f32 %v694_v39, %v2737_v19  ;;  %v992_v35 = vadd.f32 %v2816_v48, %v2752_v44  ;;  %v990_v25 = vadd.f32 %v2780_v11, %v2745_v27 }
 0x133   : > { %3731 = vst [vmem:[#allocation43_spill] sm:$0xff] %v2989_v24  ;;  %v591_v2 = vpop.f32.mrb[21].mxu0  ;;  %v2996_v45 = vpop.f32.mrb[21].mxu1  ;;  %v3011_v10 = vmul.f32 %v888_v6, %v2929_v50  ;;  %v3014_v24 = vmul.f32 0.5, %v2742_v26  ;;  %v1052_v43 = vmul.f32 0.7978846, %v988_v56  ;;  %v994_v39 = vadd.f32 %v2827_v55, %v2755_v46 }
 0x134   : > { %3732 = vst [vmem:[#allocation44_spill] sm:$0xff] %v3000_v41  ;;  %v3006_v38 = vpop.f32.mrb[22].mxu0  ;;  %v3008_v40 = vpop.f32.mrb[22].mxu1  ;;  %v1056_v59 = vmul.f32 0.7978846, %v992_v35  ;;  %v3023_v31 = vadd.f32 %v583_v61, %v2731_v16  ;;  %v3026_v7 = vadd.f32 %v696_v21, %v2733_v17  ;;  %v3029_v6 = vmul.f32 %v890_v14, %v2932_v33 }
 0x135   : > { %3733 = vst [vmem:[#allocation45_spill] sm:$0xff] %v3011_v10  ;;  %v3018_v57 = vpop.f32.mrb[23].mxu0  ;;  %v3020_v48 = vpop.f32.mrb[23].mxu1  ;;  %v1054_v11 = vmul.f32 0.7978846, %v990_v25  ;;  %2240 = vtanh.f32 %v1052_v43  ;;  %v1179_v56 = vadd.f32 1.0, %v2865_v34  ;;  %v892_v14 = vmul.f32 %v828_v1, %v2967_v49 }
 0x136   : > { %3734 = vst [vmem:[#allocation46_spill] sm:$0xff] %v3023_v31  ;;  %3735 = vst [vmem:[#allocation47_spill] sm:$0xff] %v3026_v7  ;;  %v1058_v26 = vmul.f32 0.7978846, %v994_v39  ;;  %v830_v55 = vmul.f32 0.044715, %v3000_v41  ;;  %2242 = vtanh.f32 %v1056_v59 }
 0x137   : > { %3736 = vst [vmem:[#allocation48_spill] sm:$0xff] %v3029_v6  ;;  %v831_v23 = vmul.f32 0.044715, %v3023_v31  ;;  %v1183_v35 = vadd.f32 1.0, %v2895_v0  ;;  %2244 = vtanh.f32 %v1054_v11  ;;  %v833_v61 = vmul.f32 0.044715, %v3026_v7 }
 0x138   : > { %v1181_v21 = vadd.f32 1.0, %v2885_v52  ;;  %v1185_v25 = vadd.f32 1.0, %v2915_v15  ;;  %2246 = vtanh.f32 %v1058_v26  ;;  %v3040_v43 = vmul.f32 %v1179_v56, %v2765_v60 }
 0x139   : > { %v3043_v34 = vmul.f32 %v1183_v35, %v2782_v12  ;;  %v3057_v15 = vadd.f32 %v2943_v37, %v2735_v18  ;;  %v3061_v60 = vadd.f32 %v2945_v42, %v2737_v19  ;;  %v3068_v11 = vmul.f32 %v891_v58, %v2935_v51 }
 0x13a   : > { %v3045_v59 = vpop.f32.mrb[24].mxu0  ;;  %v3047_v39 = vpop.f32.mrb[24].mxu1  ;;  %v3050_v0 = vmul.f32 %v1181_v21, %v2768_v3  ;;  %v3053_v52 = vmul.f32 %v1185_v25, %v2784_v13  ;;  %v894_v3 = vmul.f32 %v830_v55, %v3000_v41  ;;  %v3074_v26 = vadd.f32 %v589_v32, %v2731_v16 }
 0x13b   : > { %v3063_v12 = vpop.f32.mrb[25].mxu0  ;;  %v3065_v1 = vpop.f32.mrb[25].mxu1  ;;  %3737 = vst [vmem:[#allocation49_spill] sm:$0xff] %v3068_v11  ;;  %v895_v42 = vmul.f32 %v831_v23, %v3023_v31  ;;  %v897_v35 = vmul.f32 %v833_v61, %v3026_v7  ;;  %v3085_v21 = vadd.f32 %v702_v62, %v2733_v17  ;;  %v3092_v32 = vmul.f32 %v893_v20, %v2941_v53 }
 0x13c   : > { %3738 = vst [vmem:[#allocation50_spill] sm:$0xff] %v3074_v26  ;;  %v3076_v37 = vpop.f32.mrb[26].mxu0  ;;  %v3078_v56 = vpop.f32.mrb[26].mxu1  ;;  %v736_v13 = vmul.f32 0.5, %v2752_v44  ;;  %v832_v11 = vmul.f32 0.044715, %v3057_v15  ;;  %v3097_v23 = vadd.f32 %v591_v2, %v2735_v18  ;;  %v3100_v61 = vmul.f32 %v892_v14, %v2967_v49 }
 0x13d   : > { %3739 = vst [vmem:[#allocation51_spill] sm:$0xff] %v3085_v21  ;;  %v3087_v55 = vpop.f32.mrb[27].mxu0  ;;  %v3089_v25 = vpop.f32.mrb[27].mxu1  ;;  %3740 = vst [vmem:[#allocation52_spill] sm:$0xff] %v3092_v32  ;;  %v734_v62 = vmul.f32 0.5, %v2745_v27  ;;  %v738_v58 = vmul.f32 0.5, %v2755_v46  ;;  %v3106_v6 = vmul.f32 %v894_v3, %v3000_v41  ;;  %v3111_v44 = vadd.f32 %v2996_v45, %v2737_v19 }
 0x13e   : > { %3741 = vst [vmem:[#allocation53_spill] sm:$0xff] %v3100_v61  ;;  %v834_v51 = vmul.f32 0.044715, %v3061_v60  ;;  %v835_v20 = vmul.f32 0.044715, %v3074_v26  ;;  %v996_v2 = vadd.f32 %v2850_v8, %v2774_v9  ;;  %v3116_v32 = vmul.f32 %v895_v42, %v3023_v31  ;;  %v3745_v3 = vld [vmem:[#allocation22_spill] sm:$0xff] }
 0x13f   : > { %3742 = vst [vmem:[#allocation54_spill] sm:$0xff] %v3106_v6  ;;  %v2241_v14 = vpop.eup %2240  ;;  %v3119_v27 = vmul.f32 %v897_v35, %v3026_v7  ;;  %v837_v46 = vmul.f32 0.044715, %v3085_v21  ;;  %v1000_v53 = vadd.f32 %v3745_v3, %v2802_v36  ;;  %v896_v45 = vmul.f32 %v832_v11, %v3057_v15 }
 0x140   : > { %3743 = vst [vmem:[#allocation55_spill] sm:$0xff] %v3116_v32  ;;  %v2243_v6 = vpop.eup %2242  ;;  %v1180_v41 = vadd.f32 1.0, %v2241_v14  ;;  %v836_v61 = vmul.f32 0.044715, %v3097_v23  ;;  %v3127_v8 = vmul.f32 0.5, %v2774_v9  ;;  %v898_v7 = vmul.f32 %v834_v51, %v3061_v60 }
 0x141   : > { %3744 = vst [vmem:[#allocation56_spill] sm:$0xff] %v3119_v27  ;;  %v2245_v35 = vpop.eup %2244  ;;  %v1184_v27 = vadd.f32 1.0, %v2243_v6  ;;  %v1060_v32 = vmul.f32 0.7978846, %v996_v2  ;;  %v1064_v31 = vmul.f32 0.7978846, %v1000_v53  ;;  %v899_v11 = vmul.f32 %v835_v20, %v3074_v26 }
 0x142   : > { %v3129_v49 = vpop.f32.mrb[28].mxu0  ;;  %v3131_v42 = vpop.f32.mrb[28].mxu1  ;;  %v1182_v33 = vadd.f32 1.0, %v2245_v35  ;;  %v838_v10 = vmul.f32 0.044715, %v3111_v44  ;;  %v3139_v9 = vmul.f32 0.5, %v2802_v36  ;;  %v1244_v6 = vmul.f32 %v1180_v41, %v3014_v24 }
 0x143   : > { %3746 = vst [vmem:[#allocation22_spill] sm:$0xff] %v3129_v49  ;;  %3747 = vst [vmem:[#allocation57_spill] sm:$0xff] %v3131_v42  ;;  %v3134_v3 = vpop.f32.mrb[29].mxu0  ;;  %v2247_v14 = vpop.eup %2246  ;;  %v1248_v51 = vmul.f32 %v1184_v27, %v736_v13  ;;  %2248 = vtanh.f32 %v1060_v32  ;;  %v901_v20 = vmul.f32 %v837_v46, %v3085_v21  ;;  %v900_v35 = vmul.f32 %v836_v61, %v3097_v23  ;;  %v3751_v36 = vld [vmem:[#allocation7_spill] sm:$0xff]  ;;  %v3753_v24 = vld [vmem:[#allocation10_spill] sm:$0xff] }
 0x144   : > { %3748 = vst [vmem:[#allocation58_spill] sm:$0xff] %v3134_v3  ;;  %v3141_v50 = vpop.f32.mrb[29].mxu1  ;;  %v3143_v28 = vpop.f32.mrb[30].mxu0  ;;  %v1186_v2 = vadd.f32 1.0, %v2247_v14  ;;  %2250 = vtanh.f32 %v1064_v31  ;;  %v3752_v3 = vld [vmem:[#allocation18_spill] sm:$0xff]  ;;  %v1246_v49 = vmul.f32 %v1182_v33, %v734_v62  ;;  %v3754_v13 = vld [vmem:[#allocation23_spill] sm:$0xff]  ;;  %v3159_v27 = vmul.f32 %v896_v45, %v3057_v15 }
 0x145   : > { %3749 = vst [vmem:[#allocation59_spill] sm:$0xff] %v3141_v50  ;;  %3750 = vst [vmem:[#allocation60_spill] sm:$0xff] %v3143_v28  ;;  %v3146_v53 = vpop.f32.mrb[30].mxu1  ;;  %v3148_v63 = vpop.f32.mrb[31].mxu0  ;;  %v998_v42 = vadd.f32 %v3752_v3, %v3751_v36  ;;  %v1308_v28 = vpack.c.bf16 %v1248_v51, %v1244_v6  ;;  %v1002_v32 = vadd.f32 %v3754_v13, %v3753_v24  ;;  %v3758_v62 = vld [vmem:[#allocation14_spill] sm:$0xff] }
 0x146   : > { %v3154_v50 = vpop.f32.mrb[31].mxu1  ;;  %v1250_v41 = vmul.f32 %v1186_v2, %v738_v58  ;;  %v3162_v14 = vmul.f32 %v898_v7, %v3061_v60  ;;  %v3166_v31 = vadd.f32 %v3006_v38, %v2731_v16  ;;  %v3170_v33 = vadd.f32 %v3008_v40, %v2733_v17  ;;  %v3757_v58 = vld [vmem:[#allocation5_spill] sm:$0xff] }
 0x147   : > { %v1062_v46 = vmul.f32 0.7978846, %v998_v42  ;;  %1634 = vmatprep.mubr.bf16.mxu0 %v1308_v28  ;;  %v1066_v3 = vmul.f32 0.7978846, %v1002_v32  ;;  %v995_v6 = vadd.f32 %v3758_v62, %v3757_v58  ;;  %v3759_v45 = vpack.c.bf16 %v3043_v34, %v3040_v43  ;;  %v3761_v28 = vld [vmem:[#allocation8_spill] sm:$0xff]  ;;  %v3767_v32 = vld [vmem:[#allocation9_spill] sm:$0xff] }
 0x148   : > { %3755 = vst [vmem:[#allocation7_spill] sm:$0xff] %v3166_v31  ;;  %v1310_v61 = vpack.c.bf16 %v1250_v41, %v1246_v49  ;;  %3756 = vst [vmem:[#allocation18_spill] sm:$0xff] %v3170_v33  ;;  %v3178_v7 = vmul.f32 %v899_v11, %v3074_v26  ;;  %v902_v38 = vmul.f32 %v838_v10, %v3111_v44  ;;  %v3762_v49 = vld [vmem:[#allocation19_spill] sm:$0xff]  ;;  %v839_v34 = vmul.f32 0.044715, %v3166_v31  ;;  %v3765_v11 = vld [vmem:[#allocation6_spill] sm:$0xff] }
 0x149   : > { %1635 = vmatmul.mubr.bf16.vlgmr.msra.gmra.mrb[32].mxu0 %v3759_v45  ;;  %2252 = vtanh.f32 %v1062_v46  ;;  %v999_v42 = vadd.f32 %v3762_v49, %v3761_v28  ;;  %v3184_v40 = vmul.f32 %v901_v20, %v3085_v21  ;;  %v3187_v51 = vmul.f32 %v900_v35, %v3097_v23  ;;  %v3766_v41 = vld [vmem:[#allocation15_spill] sm:$0xff]  ;;  %v3768_v46 = vld [vmem:[#allocation20_spill] sm:$0xff] }
 0x14a   : > { %3760 = vst [vmem:[#allocation10_spill] sm:$0xff] %v3178_v7  ;;  %1731 = vmatprep.mubr.bf16.mxu1 %v1310_v61  ;;  %2254 = vtanh.f32 %v1066_v3  ;;  %v1059_v2 = vmul.f32 0.7978846, %v995_v6  ;;  %v3764_v43 = vpack.c.bf16 %v3053_v52, %v3050_v0  ;;  %v997_v13 = vadd.f32 %v3766_v41, %v3765_v11 }
 0x14b   : > { %3763 = vst [vmem:[#allocation23_spill] sm:$0xff] %v3184_v40  ;;  %v1063_v10 = vmul.f32 0.7978846, %v999_v42  ;;  %v1001_v61 = vadd.f32 %v3768_v46, %v3767_v32  ;;  %v841_v20 = vmul.f32 0.044715, %v3170_v33  ;;  %v3200_v35 = vadd.f32 %v3018_v57, %v2735_v18 }
 0x14c   : > { %1732 = vmatmul.mubr.bf16.vlgmr.msra.gmra.mrb[32].mxu1 %v3764_v43  ;;  %2256 = vtanh.f32 %v1059_v2  ;;  %v3204_v0 = vadd.f32 %v3020_v48, %v2737_v19  ;;  %v3207_v52 = vmul.f32 %v902_v38, %v3111_v44  ;;  %v1061_v3 = vmul.f32 0.7978846, %v997_v13 }
 0x14d   : > { %2258 = vtanh.f32 %v1063_v10  ;;  %v1065_v62 = vmul.f32 0.7978846, %v1001_v61  ;;  %v2249_v6 = vpop.eup %2248  ;;  %v742_v45 = vmul.f32 0.5, %v3751_v36  ;;  %v840_v49 = vmul.f32 0.044715, %v3200_v35 }
 0x14e   : > { %v842_v42 = vmul.f32 0.044715, %v3204_v0  ;;  %v3214_v57 = vadd.f32 %v3045_v59, %v2731_v16  ;;  %v2251_v2 = vpop.eup %2250  ;;  %v1188_v48 = vadd.f32 1.0, %v2249_v6  ;;  %v746_v43 = vmul.f32 0.5, %v3753_v24 }
 0x14f   : > { %2260 = vtanh.f32 %v1061_v3  ;;  %v3219_v38 = vadd.f32 %v3047_v39, %v2733_v17  ;;  %v1192_v10 = vadd.f32 1.0, %v2251_v2  ;;  %v903_v36 = vmul.f32 %v839_v34, %v3166_v31 }
 0x150   : > { %v905_v41 = vmul.f32 %v841_v20, %v3170_v33  ;;  %2262 = vtanh.f32 %v1065_v62  ;;  %v739_v13 = vmul.f32 0.5, %v3757_v58  ;;  %v904_v59 = vmul.f32 %v840_v49, %v3200_v35 }
 0x151   : > { %3769 = vst [vmem:[#allocation5_spill] sm:$0xff] %v3219_v38  ;;  %v906_v46 = vmul.f32 %v842_v42, %v3204_v0  ;;  %v3228_v24 = vadd.f32 %v3063_v12, %v2735_v18  ;;  %v1252_v61 = vmul.f32 %v1188_v48, %v3127_v8  ;;  %v1256_v39 = vmul.f32 %v1192_v10, %v3139_v9 }
 0x152   : > { %v843_v3 = vmul.f32 0.044715, %v3214_v57  ;;  %v3235_v34 = vadd.f32 %v3065_v1, %v2737_v19  ;;  %v743_v58 = vmul.f32 0.5, %v3761_v28  ;;  %v741_v62 = vmul.f32 0.5, %v3765_v11 }
 0x153   : > { %v2253_v20 = vpop.eup %2252  ;;  %v745_v6 = vmul.f32 0.5, %v3767_v32  ;;  %v845_v12 = vmul.f32 0.044715, %v3219_v38  ;;  %v1312_v42 = vpack.c.bf16 %v1256_v39, %v1252_v61  ;;  %v3242_v9 = vmul.f32 %v903_v36, %v3166_v31  ;;  %v3773_v36 = vld [vmem:[#allocation13_spill] sm:$0xff]  ;;  %v3774_v39 = vld [vmem:[#allocation27_spill] sm:$0xff] }
 0x154   : > { %v2255_v49 = vpop.eup %2254  ;;  %v1190_v8 = vadd.f32 1.0, %v2253_v20  ;;  %v3245_v2 = vmul.f32 %v905_v41, %v3170_v33  ;;  %v3248_v48 = vmul.f32 %v904_v59, %v3200_v35  ;;  %v3251_v28 = vmul.f32 %v906_v46, %v3204_v0  ;;  %v3776_v31 = vld [vmem:[#allocation35_spill] sm:$0xff] }
 0x155   : > { %3770 = vst [vmem:[#allocation14_spill] sm:$0xff] %v3242_v9  ;;  %v1194_v1 = vadd.f32 1.0, %v2255_v49  ;;  %v844_v11 = vmul.f32 0.044715, %v3228_v24  ;;  %1642 = vmatprep.mubr.bf16.mxu0 %v1312_v42  ;;  %v907_v10 = vmul.f32 %v843_v3, %v3214_v57  ;;  %v846_v61 = vmul.f32 0.044715, %v3235_v34 }
 0x156   : > { %3771 = vst [vmem:[#allocation8_spill] sm:$0xff] %v3245_v2  ;;  %3772 = vst [vmem:[#allocation19_spill] sm:$0xff] %v3251_v28  ;;  %v2257_v32 = vpop.eup %2256  ;;  %v1004_v20 = vadd.f32 %v3774_v39, %v3773_v36  ;;  %v1008_v41 = vadd.f32 %v2964_v54, %v2857_v29  ;;  %v1254_v59 = vmul.f32 %v1190_v8, %v742_v45  ;;  %v3775_v42 = vld [vmem:[#allocation16_spill] sm:$0xff] }
 0x157   : > { %v2259_v49 = vpop.eup %2258  ;;  %v1258_v2 = vmul.f32 %v1194_v1, %v746_v43  ;;  %v1187_v33 = vadd.f32 1.0, %v2257_v32  ;;  %v909_v46 = vmul.f32 %v845_v12, %v3219_v38  ;;  %v1006_v3 = vadd.f32 %v3776_v31, %v3775_v42 }
 0x158   : > { %v1191_v40 = vadd.f32 1.0, %v2259_v49  ;;  %v1068_v21 = vmul.f32 0.7978846, %v1004_v20  ;;  %v1072_v9 = vmul.f32 0.7978846, %v1008_v41  ;;  %v1010_v39 = vadd.f32 %v2970_v22, %v2860_v30  ;;  %v3782_v20 = vld [vmem:[#allocation12_spill] sm:$0xff] }
 0x159   : > { %v2261_v7 = vpop.eup %2260  ;;  %v1314_v26 = vpack.c.bf16 %v1258_v2, %v1254_v59  ;;  %v1251_v28 = vmul.f32 %v1187_v33, %v739_v13  ;;  %v3267_v54 = vadd.f32 %v3076_v37, %v2731_v16  ;;  %v1070_v12 = vmul.f32 0.7978846, %v1006_v3  ;;  %v3783_v41 = vld [vmem:[#allocation26_spill] sm:$0xff] }
 0x15a   : > { %v2263_v45 = vpop.eup %2262  ;;  %v1255_v43 = vmul.f32 %v1191_v40, %v743_v58  ;;  %v1189_v8 = vadd.f32 1.0, %v2261_v7  ;;  %2264 = vtanh.f32 %v1068_v21  ;;  %v908_v32 = vmul.f32 %v844_v11, %v3228_v24  ;;  %v3779_v40 = vld [vmem:[#allocation11_spill] sm:$0xff]  ;;  %v3780_v58 = vld [vmem:[#allocation25_spill] sm:$0xff] }
 0x15b   : > { %3777 = vst [vmem:[#allocation6_spill] sm:$0xff] %v3267_v54  ;;  %1739 = vmatprep.mubr.bf16.mxu1 %v1314_v26  ;;  %v1193_v1 = vadd.f32 1.0, %v2263_v45  ;;  %2266 = vtanh.f32 %v1072_v9  ;;  %v1074_v31 = vmul.f32 0.7978846, %v1010_v39  ;;  %v910_v33 = vmul.f32 %v846_v61, %v3235_v34 }
 0x15c   : > { %v1311_v2 = vpack.c.bf16 %v1255_v43, %v1251_v28  ;;  %v748_v22 = vmul.f32 0.5, %v3773_v36  ;;  %2268 = vtanh.f32 %v1070_v12  ;;  %v1253_v13 = vmul.f32 %v1189_v8, %v741_v62  ;;  %v3785_v12 = vld [vmem:[#allocation22_spill] sm:$0xff] }
 0x15d   : > { %v1257_v37 = vmul.f32 %v1193_v1, %v745_v6  ;;  %2270 = vtanh.f32 %v1074_v31  ;;  %v3274_v7 = vadd.f32 %v3078_v56, %v2733_v17  ;;  %v752_v26 = vmul.f32 0.5, %v2857_v29 }
 0x15e   : > { %1643 = vmatmul.mubr.bf16.gmra.mrb[36].mxu0 %v1311_v2  ;;  %v847_v21 = vmul.f32 0.044715, %v3267_v54  ;;  %v1003_v9 = vadd.f32 %v3780_v58, %v3779_v40  ;;  %v1007_v28 = vadd.f32 %v2958_v47, %v2844_v4  ;;  %v3283_v62 = vmul.f32 %v907_v10, %v3214_v57  ;;  %v3784_v10 = vld [vmem:[#allocation36_spill] sm:$0xff] }
 0x15f   : > { %3778 = vst [vmem:[#allocation15_spill] sm:$0xff] %v3274_v7  ;;  %v1313_v11 = vpack.c.bf16 %v1257_v37, %v1253_v13  ;;  %v3286_v6 = vmul.f32 %v909_v46, %v3219_v38  ;;  %v3289_v56 = vmul.f32 %v908_v32, %v3228_v24  ;;  %v3292_v29 = vmul.f32 %v910_v33, %v3235_v34  ;;  %v3786_v32 = vld [vmem:[#allocation57_spill] sm:$0xff] }
 0x160   : > { %v1067_v61 = vmul.f32 0.7978846, %v1003_v9  ;;  %v1071_v36 = vmul.f32 0.7978846, %v1007_v28  ;;  %v1005_v49 = vadd.f32 %v3783_v41, %v3782_v20  ;;  %v849_v47 = vmul.f32 0.044715, %v3274_v7 }
 0x161   : > { %3781 = vst [vmem:[#allocation9_spill] sm:$0xff] %v3286_v6  ;;  %1740 = vmatmul.mubr.bf16.gmra.mrb[36].mxu1 %v1313_v11  ;;  %v1009_v59 = vadd.f32 %v3784_v10, %v2847_v5  ;;  %v3301_v46 = vadd.f32 %v3087_v55, %v2735_v18  ;;  %v3305_v3 = vadd.f32 %v3089_v25, %v2737_v19  ;;  %v750_v39 = vmul.f32 0.5, %v3775_v42 }
 0x162   : > { %v911_v45 = vmul.f32 %v847_v21, %v3267_v54  ;;  %2272 = vtanh.f32 %v1067_v61  ;;  %v1069_v43 = vmul.f32 0.7978846, %v1005_v49  ;;  %v3311_v1 = vadd.f32 %v3785_v12, %v2731_v16  ;;  %v3788_v49 = vld [vmem:[#allocation58_spill] sm:$0xff]  ;;  %v3790_v12 = vld [vmem:[#allocation59_spill] sm:$0xff] }
 0x163   : > { %2274 = vtanh.f32 %v1071_v36  ;;  %v1073_v8 = vmul.f32 0.7978846, %v1009_v59  ;;  %v3315_v55 = vadd.f32 %v3786_v32, %v2733_v17  ;;  %v754_v25 = vmul.f32 0.5, %v2860_v30 }
 0x164   : > { %v2265_v31 = vpop.eup %2264  ;;  %v747_v2 = vmul.f32 0.5, %v3779_v40  ;;  %2276 = vtanh.f32 %v1069_v43  ;;  %v848_v42 = vmul.f32 0.044715, %v3301_v46  ;;  %v913_v37 = vmul.f32 %v849_v47, %v3274_v7 }
 0x165   : > { %v2267_v33 = vpop.eup %2266  ;;  %v1196_v13 = vadd.f32 1.0, %v2265_v31  ;;  %2278 = vtanh.f32 %v1073_v8  ;;  %v850_v21 = vmul.f32 0.044715, %v3305_v3  ;;  %v3323_v28 = vmul.f32 %v911_v45, %v3267_v54 }
 0x166   : > { %v2269_v58 = vpop.eup %2268  ;;  %v1200_v9 = vadd.f32 1.0, %v2267_v33  ;;  %v751_v11 = vmul.f32 0.5, %v2844_v4  ;;  %v749_v30 = vmul.f32 0.5, %v3782_v20  ;;  %v851_v36 = vmul.f32 0.044715, %v3311_v1 }
 0x167   : > { %3787 = vst [vmem:[#allocation20_spill] sm:$0xff] %v3323_v28  ;;  %v2271_v40 = vpop.eup %2270  ;;  %v1198_v61 = vadd.f32 1.0, %v2269_v58  ;;  %v853_v41 = vmul.f32 0.044715, %v3315_v55  ;;  %v3331_v47 = vadd.f32 %v3788_v49, %v2735_v18  ;;  %v1260_v10 = vmul.f32 %v1196_v13, %v748_v22  ;;  %v3791_v49 = vld [vmem:[#allocation24_spill] sm:$0xff] }
 0x168   : > { %v1264_v59 = vmul.f32 %v1200_v9, %v752_v26  ;;  %v1202_v43 = vadd.f32 1.0, %v2271_v40  ;;  %v912_v45 = vmul.f32 %v848_v42, %v3301_v46  ;;  %v3335_v8 = vmul.f32 %v913_v37, %v3274_v7  ;;  %v3792_v22 = vld [vmem:[#allocation40_spill] sm:$0xff]  ;;  %v3793_v9 = vld [vmem:[#allocation31_spill] sm:$0xff] }
 0x169   : > { %v753_v4 = vmul.f32 0.5, %v2847_v5  ;;  %v914_v20 = vmul.f32 %v850_v21, %v3305_v3  ;;  %v3341_v32 = vadd.f32 %v3790_v12, %v2737_v19  ;;  %v1262_v33 = vmul.f32 %v1198_v61, %v750_v39  ;;  %v3794_v5 = vld [vmem:[#allocation45_spill] sm:$0xff]  ;;  %v3798_v7 = vld [vmem:[#allocation48_spill] sm:$0xff] }
 0x16a   : > { %3789 = vst [vmem:[#allocation13_spill] sm:$0xff] %v3335_v8  ;;  %v1316_v31 = vpack.c.bf16 %v1264_v59, %v1260_v10  ;;  %v1266_v58 = vmul.f32 %v1202_v43, %v754_v25  ;;  %v1012_v26 = vadd.f32 %v3792_v22, %v3791_v49  ;;  %v915_v13 = vmul.f32 %v851_v36, %v3311_v1  ;;  %v3795_v25 = vld [vmem:[#allocation28_spill] sm:$0xff]  ;;  %v3796_v61 = vld [vmem:[#allocation41_spill] sm:$0xff] }
 0x16b   : > { %v917_v42 = vmul.f32 %v853_v41, %v3315_v55  ;;  %v852_v37 = vmul.f32 0.044715, %v3331_v47  ;;  %v1016_v40 = vadd.f32 %v3794_v5, %v3793_v9  ;;  %v3351_v12 = vmul.f32 %v912_v45, %v3301_v46  ;;  %v3797_v22 = vld [vmem:[#allocation32_spill] sm:$0xff] }
 0x16c   : > { %v2273_v21 = vpop.eup %2272  ;;  %1650 = vmatprep.mubr.bf16.mxu0 %v1316_v31  ;;  %v1318_v8 = vpack.c.bf16 %v1266_v58, %v1262_v33  ;;  %v1076_v39 = vmul.f32 0.7978846, %v1012_v26  ;;  %v1014_v10 = vadd.f32 %v3796_v61, %v3795_v25  ;;  %v854_v36 = vmul.f32 0.044715, %v3341_v32 }
 0x16d   : > { %v2275_v59 = vpop.eup %2274  ;;  %v1195_v43 = vadd.f32 1.0, %v2273_v21  ;;  %v1080_v41 = vmul.f32 0.7978846, %v1016_v40  ;;  %v1018_v6 = vadd.f32 %v3798_v7, %v3797_v22  ;;  %v3359_v31 = vmul.f32 %v914_v20, %v3305_v3  ;;  %v3799_v21 = vld [vmem:[#allocation60_spill] sm:$0xff] }
 0x16e   : > { %v2277_v38 = vpop.eup %2276  ;;  %1747 = vmatprep.mubr.bf16.mxu1 %v1318_v8  ;;  %v1199_v5 = vadd.f32 1.0, %v2275_v59  ;;  %2280 = vtanh.f32 %v1076_v39  ;;  %v1078_v45 = vmul.f32 0.7978846, %v1014_v10  ;;  %v3363_v61 = vadd.f32 %v3799_v21, %v2731_v16  ;;  %v3802_v59 = vld [vmem:[#allocation38_spill] sm:$0xff]  ;;  %v3808_v21 = vld [vmem:[#allocation43_spill] sm:$0xff] }
 0x16f   : > { %v2279_v33 = vpop.eup %2278  ;;  %v1259_v58 = vmul.f32 %v1195_v43, %v747_v2  ;;  %v1197_v26 = vadd.f32 1.0, %v2277_v38  ;;  %2282 = vtanh.f32 %v1080_v41  ;;  %v1082_v54 = vmul.f32 0.7978846, %v1018_v6  ;;  %v3801_v6 = vld [vmem:[#allocation17_spill] sm:$0xff]  ;;  %v3804_v41 = vld [vmem:[#allocation42_spill] sm:$0xff] }
 0x170   : > { %v1263_v40 = vmul.f32 %v1199_v5, %v751_v11  ;;  %v1201_v28 = vadd.f32 1.0, %v2279_v33  ;;  %2284 = vtanh.f32 %v1078_v45  ;;  %v3366_v7 = vmul.f32 %v915_v13, %v3311_v1  ;;  %v3803_v13 = vld [vmem:[#allocation29_spill] sm:$0xff] }
 0x171   : > { %v3369_v8 = vmul.f32 %v917_v42, %v3315_v55  ;;  %v916_v20 = vmul.f32 %v852_v37, %v3331_v47  ;;  %v918_v2 = vmul.f32 %v854_v36, %v3341_v32  ;;  %v1261_v39 = vmul.f32 %v1197_v26, %v749_v30  ;;  %v3807_v26 = vld [vmem:[#allocation30_spill] sm:$0xff] }
 0x172   : > { %v1315_v38 = vpack.c.bf16 %v1263_v40, %v1259_v58  ;;  %v1265_v10 = vmul.f32 %v1201_v28, %v753_v4  ;;  %2286 = vtanh.f32 %v1082_v54  ;;  %v756_v16 = vmul.f32 0.5, %v3791_v49  ;;  %v3805_v28 = vld [vmem:[#allocation21_spill] sm:$0xff]  ;;  %v3806_v54 = vld [vmem:[#allocation39_spill] sm:$0xff] }
 0x173   : > { %3800 = vst [vmem:[#allocation27_spill] sm:$0xff] %v3369_v8  ;;  %v855_v11 = vmul.f32 0.044715, %v3363_v61  ;;  %v1011_v43 = vadd.f32 %v3802_v59, %v3801_v6  ;;  %v1015_v5 = vadd.f32 %v3804_v41, %v3803_v13  ;;  %v760_v37 = vmul.f32 0.5, %v3793_v9  ;;  %v3820_v8 = vld [vmem:[#allocation56_spill] sm:$0xff] }
 0x174   : > { %1651 = vmatmul.mubr.bf16.gmra.mrb[40].mxu0 %v1315_v38  ;;  %v1317_v42 = vpack.c.bf16 %v1265_v10, %v1261_v39  ;;  %v3382_v36 = vadd.f32 %v3146_v53, %v2733_v17  ;;  %v1013_v30 = vadd.f32 %v3806_v54, %v3805_v28  ;;  %v3387_v4 = vmul.f32 %v916_v20, %v3331_v47 }
 0x175   : > { %v758_v49 = vmul.f32 0.5, %v3795_v25  ;;  %v1075_v45 = vmul.f32 0.7978846, %v1011_v43  ;;  %v1079_v33 = vmul.f32 0.7978846, %v1015_v5  ;;  %v3391_v58 = vmul.f32 %v918_v2, %v3341_v32  ;;  %v3810_v43 = vld [vmem:[#allocation53_spill] sm:$0xff] }
 0x176   : > { %1748 = vmatmul.mubr.bf16.gmra.mrb[40].mxu1 %v1317_v42  ;;  %v762_v9 = vmul.f32 0.5, %v3797_v22  ;;  %v1017_v17 = vadd.f32 %v3808_v21, %v3807_v26  ;;  %v1077_v53 = vmul.f32 0.7978846, %v1013_v30  ;;  %v919_v40 = vmul.f32 %v855_v11, %v3363_v61  ;;  %v3809_v11 = vld [vmem:[#allocation37_spill] sm:$0xff] }
 0x177   : > { %v3398_v38 = vmul.f32 0.5, %v3801_v6  ;;  %v3401_v20 = vmul.f32 0.5, %v3803_v13  ;;  %2288 = vtanh.f32 %v1075_v45  ;;  %v857_v39 = vmul.f32 0.044715, %v3382_v36 }
 0x178   : > { %v2281_v25 = vpop.eup %2280  ;;  %2290 = vtanh.f32 %v1079_v33  ;;  %v1081_v2 = vmul.f32 0.7978846, %v1017_v17  ;;  %v3406_v22 = vadd.f32 %v3148_v63, %v2735_v18  ;;  %v1020_v6 = vadd.f32 %v3810_v43, %v3809_v11  ;;  %v3813_v43 = vld [vmem:[#allocation33_spill] sm:$0xff] }
 0x179   : > { %v2283_v10 = vpop.eup %2282  ;;  %v1204_v59 = vadd.f32 1.0, %v2281_v25  ;;  %2292 = vtanh.f32 %v1077_v53  ;;  %v1024_v13 = vadd.f32 %v3159_v27, %v3057_v15  ;;  %v757_v42 = vmul.f32 0.5, %v3805_v28 }
 0x17a   : > { %v2285_v41 = vpop.eup %2284  ;;  %v1208_v5 = vadd.f32 1.0, %v2283_v10  ;;  %v761_v54 = vmul.f32 0.5, %v3807_v26  ;;  %2294 = vtanh.f32 %v1081_v2  ;;  %v3416_v18 = vadd.f32 %v3154_v50, %v2737_v19  ;;  %v3811_v19 = vld [vmem:[#allocation44_spill] sm:$0xff]  ;;  %v3812_v50 = vld [vmem:[#allocation54_spill] sm:$0xff] }
 0x17b   : > { %v1206_v30 = vadd.f32 1.0, %v2285_v41  ;;  %v1084_v63 = vmul.f32 0.7978846, %v1020_v6  ;;  %v1088_v45 = vmul.f32 0.7978846, %v1024_v13  ;;  %v1268_v21 = vmul.f32 %v1204_v59, %v756_v16  ;;  %v3814_v6 = vld [vmem:[#allocation49_spill] sm:$0xff] }
 0x17c   : > { %v2287_v33 = vpop.eup %2286  ;;  %v1272_v17 = vmul.f32 %v1208_v5, %v760_v37  ;;  %v3419_v53 = vmul.f32 %v919_v40, %v3363_v61  ;;  %v856_v27 = vmul.f32 0.044715, %v3406_v22  ;;  %v3423_v28 = vmul.f32 %v857_v39, %v3382_v36  ;;  %v3815_v5 = vld [vmem:[#allocation46_spill] sm:$0xff] }
 0x17d   : > { %v1210_v25 = vadd.f32 1.0, %v2287_v33  ;;  %v764_v26 = vmul.f32 0.5, %v3809_v11  ;;  %2296 = vtanh.f32 %v1084_v63  ;;  %v1022_v10 = vadd.f32 %v3812_v50, %v3811_v19  ;;  %v3816_v63 = vld [vmem:[#allocation55_spill] sm:$0xff] }
 0x17e   : > { %v1320_v2 = vpack.c.bf16 %v1272_v17, %v1268_v21  ;;  %2298 = vtanh.f32 %v1088_v45  ;;  %v1026_v16 = vadd.f32 %v3162_v14, %v3061_v60  ;;  %v1270_v37 = vmul.f32 %v1206_v30, %v758_v49  ;;  %v3817_v49 = vld [vmem:[#allocation34_spill] sm:$0xff] }
 0x17f   : > { %v1274_v40 = vmul.f32 %v1210_v25, %v762_v9  ;;  %v858_v59 = vmul.f32 0.044715, %v3416_v18  ;;  %v1019_v13 = vadd.f32 %v3814_v6, %v3813_v43  ;;  %v920_v39 = vmul.f32 %v856_v27, %v3406_v22  ;;  %v3818_v9 = vld [vmem:[#allocation52_spill] sm:$0xff] }
 0x180   : > { %1658 = vmatprep.mubr.bf16.mxu0 %v1320_v2  ;;  %v1086_v11 = vmul.f32 0.7978846, %v1022_v10  ;;  %v1090_v41 = vmul.f32 0.7978846, %v1026_v16  ;;  %v1023_v45 = vadd.f32 %v3816_v63, %v3815_v5  ;;  %v768_v17 = vmul.f32 0.5, %v3057_v15  ;;  %v3819_v2 = vld [vmem:[#allocation47_spill] sm:$0xff] }
 0x181   : > { %v2289_v33 = vpop.eup %2288  ;;  %v1322_v21 = vpack.c.bf16 %v1274_v40, %v1270_v37  ;;  %v1083_v14 = vmul.f32 0.7978846, %v1019_v13  ;;  %v1021_v30 = vadd.f32 %v3818_v9, %v3817_v49  ;;  %v1025_v27 = vadd.f32 %v3820_v8, %v3819_v2 }
 0x182   : > { %v2291_v25 = vpop.eup %2290  ;;  %v1203_v50 = vadd.f32 1.0, %v2289_v33  ;;  %2300 = vtanh.f32 %v1086_v11  ;;  %v1087_v6 = vmul.f32 0.7978846, %v1023_v45  ;;  %v3442_v63 = vmul.f32 %v858_v59, %v3416_v18 }
 0x183   : > { %v2293_v10 = vpop.eup %2292  ;;  %1755 = vmatprep.mubr.bf16.mxu1 %v1322_v21  ;;  %v1207_v16 = vadd.f32 1.0, %v2291_v25  ;;  %2302 = vtanh.f32 %v1090_v41  ;;  %v1085_v37 = vmul.f32 0.7978846, %v1021_v30  ;;  %v3445_v13 = vmul.f32 %v920_v39, %v3406_v22 }
 0x184   : > { %v2295_v15 = vpop.eup %2294  ;;  %v1205_v40 = vadd.f32 1.0, %v2293_v10  ;;  %2304 = vtanh.f32 %v1083_v14  ;;  %v1089_v33 = vmul.f32 0.7978846, %v1025_v27  ;;  %v1267_v11 = vmul.f32 %v1203_v50, %v3398_v38  ;;  %v3821_v10 = vld [vmem:[#allocation19_spill] sm:$0xff] }
 0x185   : > { %v1271_v45 = vmul.f32 %v1207_v16, %v3401_v20  ;;  %v1209_v8 = vadd.f32 1.0, %v2295_v15  ;;  %2306 = vtanh.f32 %v1087_v6  ;;  %v766_v21 = vmul.f32 0.5, %v3811_v19 }
 0x186   : > { %2308 = vtanh.f32 %v1085_v37  ;;  %v1028_v59 = vadd.f32 %v3187_v51, %v3097_v23  ;;  %v1032_v41 = vadd.f32 %v3248_v48, %v3200_v35  ;;  %v1269_v30 = vmul.f32 %v1205_v40, %v757_v42 }
 0x187   : > { %v2297_v9 = vpop.eup %2296  ;;  %v1319_v39 = vpack.c.bf16 %v1271_v45, %v1267_v11  ;;  %v1273_v14 = vmul.f32 %v1209_v8, %v761_v54  ;;  %2310 = vtanh.f32 %v1089_v33  ;;  %v770_v20 = vmul.f32 0.5, %v3061_v60  ;;  %v3823_v45 = vld [vmem:[#allocation10_spill] sm:$0xff] }
 0x188   : > { %v2299_v25 = vpop.eup %2298  ;;  %v1212_v38 = vadd.f32 1.0, %v2297_v9  ;;  %v1092_v50 = vmul.f32 0.7978846, %v1028_v59  ;;  %v1096_v6 = vmul.f32 0.7978846, %v1032_v41  ;;  %v1030_v51 = vadd.f32 %v3207_v52, %v3111_v44  ;;  %v3822_v52 = vld [vmem:[#allocation50_spill] sm:$0xff] }
 0x189   : > { %1659 = vmatmul.mubr.bf16.gmra.mrb[44].mxu0 %v1319_v39  ;;  %v1321_v19 = vpack.c.bf16 %v1273_v14, %v1269_v30  ;;  %v1216_v27 = vadd.f32 1.0, %v2299_v25  ;;  %v1034_v48 = vadd.f32 %v3821_v10, %v3204_v0  ;;  %v763_v42 = vmul.f32 0.5, %v3813_v43  ;;  %v3824_v59 = vld [vmem:[#allocation7_spill] sm:$0xff] }
 0x18a   : > { %v1276_v16 = vmul.f32 %v1212_v38, %v764_v26  ;;  %v767_v54 = vmul.f32 0.5, %v3815_v5  ;;  %2312 = vtanh.f32 %v1092_v50  ;;  %v1094_v60 = vmul.f32 0.7978846, %v1030_v51  ;;  %v3825_v26 = vld [vmem:[#allocation14_spill] sm:$0xff]  ;;  %v3826_v39 = vld [vmem:[#allocation51_spill] sm:$0xff] }
 0x18b   : > { %1756 = vmatmul.mubr.bf16.gmra.mrb[44].mxu1 %v1321_v19  ;;  %v1280_v37 = vmul.f32 %v1216_v27, %v768_v17  ;;  %2314 = vtanh.f32 %v1096_v6  ;;  %v1098_v15 = vmul.f32 0.7978846, %v1034_v48  ;;  %v765_v33 = vmul.f32 0.5, %v3817_v49  ;;  %v3827_v17 = vld [vmem:[#allocation23_spill] sm:$0xff]  ;;  %v3828_v19 = vld [vmem:[#allocation18_spill] sm:$0xff]  ;;  %v3829_v27 = vld [vmem:[#allocation8_spill] sm:$0xff] }
 0x18c   : > { %v2301_v40 = vpop.eup %2300  ;;  %v769_v11 = vmul.f32 0.5, %v3819_v2  ;;  %v1027_v8 = vadd.f32 %v3823_v45, %v3822_v52  ;;  %v1031_v41 = vadd.f32 %v3825_v26, %v3824_v59  ;;  %2316 = vtanh.f32 %v1094_v60 }
 0x18d   : > { %v2303_v43 = vpop.eup %2302  ;;  %v1324_v9 = vpack.c.bf16 %v1280_v37, %v1276_v16  ;;  %v1214_v5 = vadd.f32 1.0, %v2301_v40  ;;  %v1029_v30 = vadd.f32 %v3827_v17, %v3826_v39  ;;  %2318 = vtanh.f32 %v1098_v15 }
 0x18e   : > { %v2305_v14 = vpop.eup %2304  ;;  %v1218_v25 = vadd.f32 1.0, %v2303_v43  ;;  %v1091_v38 = vmul.f32 0.7978846, %v1027_v8  ;;  %v1095_v49 = vmul.f32 0.7978846, %v1031_v41  ;;  %v772_v6 = vmul.f32 0.5, %v3097_v23 }
 0x18f   : > { %v2307_v50 = vpop.eup %2306  ;;  %1666 = vmatprep.mubr.bf16.mxu0 %v1324_v9  ;;  %v1211_v2 = vadd.f32 1.0, %v2305_v14  ;;  %v1033_v51 = vadd.f32 %v3829_v27, %v3828_v19  ;;  %v1093_v10 = vmul.f32 0.7978846, %v1029_v30  ;;  %v1278_v16 = vmul.f32 %v1214_v5, %v766_v21 }
 0x190   : > { %v2309_v48 = vpop.eup %2308  ;;  %v1282_v37 = vmul.f32 %v1218_v25, %v770_v20  ;;  %v1215_v60 = vadd.f32 1.0, %v2307_v50  ;;  %2320 = vtanh.f32 %v1091_v38  ;;  %v776_v23 = vmul.f32 0.5, %v3200_v35 }
 0x191   : > { %v2311_v40 = vpop.eup %2310  ;;  %v1275_v45 = vmul.f32 %v1211_v2, %v763_v42  ;;  %v1213_v26 = vadd.f32 1.0, %v2309_v48  ;;  %2322 = vtanh.f32 %v1095_v49  ;;  %v1097_v15 = vmul.f32 0.7978846, %v1033_v51 }
 0x192   : > { %v1326_v8 = vpack.c.bf16 %v1282_v37, %v1278_v16  ;;  %v1279_v41 = vmul.f32 %v1215_v60, %v767_v54  ;;  %v1217_v43 = vadd.f32 1.0, %v2311_v40  ;;  %2324 = vtanh.f32 %v1093_v10  ;;  %v3831_v60 = vld [vmem:[#allocation20_spill] sm:$0xff] }
 0x193   : > { %v774_v9 = vmul.f32 0.5, %v3111_v44  ;;  %2326 = vtanh.f32 %v1097_v15  ;;  %v1036_v21 = vadd.f32 %v3289_v56, %v3228_v24  ;;  %v1277_v17 = vmul.f32 %v1213_v26, %v765_v33 }
 0x194   : > { %v2313_v20 = vpop.eup %2312  ;;  %1763 = vmatprep.mubr.bf16.mxu1 %v1326_v8  ;;  %v1323_v5 = vpack.c.bf16 %v1279_v41, %v1275_v45  ;;  %v1281_v42 = vmul.f32 %v1217_v43, %v769_v11  ;;  %v1040_v30 = vadd.f32 %v3351_v12, %v3301_v46  ;;  %v778_v25 = vmul.f32 0.5, %v3204_v0 }
 0x195   : > { %v2315_v14 = vpop.eup %2314  ;;  %v1220_v54 = vadd.f32 1.0, %v2313_v20  ;;  %v1100_v38 = vmul.f32 0.7978846, %v1036_v21  ;;  %v1038_v44 = vadd.f32 %v3292_v29, %v3235_v34  ;;  %v1042_v50 = vadd.f32 %v3359_v31, %v3305_v3  ;;  %v3833_v20 = vld [vmem:[#allocation9_spill] sm:$0xff] }
 0x196   : > { %1667 = vmatmul.mubr.bf16.gmra.mrb[48].mxu0 %v1323_v5  ;;  %v1325_v35 = vpack.c.bf16 %v1281_v42, %v1277_v17  ;;  %v1224_v49 = vadd.f32 1.0, %v2315_v14  ;;  %v1104_v56 = vmul.f32 0.7978846, %v1040_v30  ;;  %v2317_v33 = vpop.eup %2316  ;;  %v771_v2 = vmul.f32 0.5, %v3822_v52  ;;  %v3830_v52 = vld [vmem:[#allocation6_spill] sm:$0xff] }
 0x197   : > { %v1284_v11 = vmul.f32 %v1220_v54, %v772_v6  ;;  %2328 = vtanh.f32 %v1100_v38  ;;  %v1102_v12 = vmul.f32 0.7978846, %v1038_v44  ;;  %v2319_v27 = vpop.eup %2318  ;;  %v1222_v51 = vadd.f32 1.0, %v2317_v33 }
 0x198   : > { %1764 = vmatmul.mubr.bf16.gmra.mrb[48].mxu1 %v1325_v35  ;;  %v1288_v0 = vmul.f32 %v1224_v49, %v776_v23  ;;  %2330 = vtanh.f32 %v1104_v56  ;;  %v1106_v10 = vmul.f32 0.7978846, %v1042_v50  ;;  %v1226_v29 = vadd.f32 1.0, %v2319_v27 }
 0x199   : > { %v775_v48 = vmul.f32 0.5, %v3824_v59  ;;  %2332 = vtanh.f32 %v1102_v12  ;;  %v1035_v16 = vadd.f32 %v3283_v62, %v3214_v57  ;;  %v773_v6 = vmul.f32 0.5, %v3826_v39  ;;  %v3832_v62 = vld [vmem:[#allocation5_spill] sm:$0xff] }
 0x19a   : > { %v2321_v31 = vpop.eup %2320  ;;  %v1328_v37 = vpack.c.bf16 %v1288_v0, %v1284_v11  ;;  %2334 = vtanh.f32 %v1106_v10  ;;  %v1039_v40 = vadd.f32 %v3831_v60, %v3830_v52  ;;  %v1286_v26 = vmul.f32 %v1222_v51, %v774_v9  ;;  %v3834_v9 = vld [vmem:[#allocation15_spill] sm:$0xff] }
 0x19b   : > { %v2323_v45 = vpop.eup %2322  ;;  %v1290_v15 = vmul.f32 %v1226_v29, %v778_v25  ;;  %v1219_v8 = vadd.f32 1.0, %v2321_v31  ;;  %v1099_v41 = vmul.f32 0.7978846, %v1035_v16  ;;  %v777_v23 = vmul.f32 0.5, %v3828_v19  ;;  %v3835_v25 = vld [vmem:[#allocation13_spill] sm:$0xff] }
 0x19c   : > { %v2325_v43 = vpop.eup %2324  ;;  %1674 = vmatprep.mubr.bf16.mxu0 %v1328_v37  ;;  %v1223_v59 = vadd.f32 1.0, %v2323_v45  ;;  %v1103_v21 = vmul.f32 0.7978846, %v1039_v40  ;;  %v1037_v5 = vadd.f32 %v3833_v20, %v3832_v62  ;;  %v1041_v38 = vadd.f32 %v3835_v25, %v3834_v9 }
 0x19d   : > { %v2327_v17 = vpop.eup %2326  ;;  %v1330_v39 = vpack.c.bf16 %v1290_v15, %v1286_v26  ;;  %v1283_v42 = vmul.f32 %v1219_v8, %v771_v2  ;;  %v1221_v30 = vadd.f32 1.0, %v2325_v43  ;;  %2336 = vtanh.f32 %v1099_v41 }
 0x19e   : > { %v1287_v14 = vmul.f32 %v1223_v59, %v775_v48  ;;  %v1225_v54 = vadd.f32 1.0, %v2327_v17  ;;  %2338 = vtanh.f32 %v1103_v21  ;;  %v986_v44 = vmul.f32 %v3442_v63, %v3416_v18 }
 0x19f   : > { %1771 = vmatprep.mubr.bf16.mxu1 %v1330_v39  ;;  %v1285_v19 = vmul.f32 %v1221_v30, %v773_v6  ;;  %v780_v35 = vmul.f32 0.5, %v3228_v24  ;;  %v1101_v49 = vmul.f32 0.7978846, %v1037_v5  ;;  %v1105_v33 = vmul.f32 0.7978846, %v1041_v38 }
 0x1a0   : > { %v1327_v56 = vpack.c.bf16 %v1287_v14, %v1283_v42  ;;  %v1289_v50 = vmul.f32 %v1225_v54, %v777_v23  ;;  %v1044_v11 = vadd.f32 %v3387_v4, %v3331_v47  ;;  %v784_v12 = vmul.f32 0.5, %v3301_v46 }
 0x1a1   : > { %v2329_v2 = vpop.eup %2328  ;;  %v782_v27 = vmul.f32 0.5, %v3235_v34  ;;  %2340 = vtanh.f32 %v1101_v49  ;;  %v1048_v63 = vadd.f32 %v3445_v13, %v3406_v22  ;;  %v1046_v4 = vadd.f32 %v3391_v58, %v3341_v32 }
 0x1a2   : > { %v2331_v0 = vpop.eup %2330  ;;  %1675 = vmatmul.mubr.bf16.gmra.mrb[52].mxu0 %v1327_v56  ;;  %v1329_v51 = vpack.c.bf16 %v1289_v50, %v1285_v19  ;;  %v1228_v24 = vadd.f32 1.0, %v2329_v2  ;;  %2342 = vtanh.f32 %v1105_v33  ;;  %v1108_v10 = vmul.f32 0.7978846, %v1044_v11 }
 0x1a3   : > { %v2333_v29 = vpop.eup %2332  ;;  %v1232_v48 = vadd.f32 1.0, %v2331_v0  ;;  %v1112_v16 = vmul.f32 0.7978846, %v1048_v63  ;;  %v1050_v46 = vadd.f32 %v986_v44, %v3416_v18  ;;  %v786_v37 = vmul.f32 0.5, %v3305_v3 }
 0x1a4   : > { %v2335_v31 = vpop.eup %2334  ;;  %1772 = vmatmul.mubr.bf16.gmra.mrb[52].mxu1 %v1329_v51  ;;  %v1292_v34 = vmul.f32 %v1228_v24, %v780_v35  ;;  %v1230_v13 = vadd.f32 1.0, %v2333_v29  ;;  %2344 = vtanh.f32 %v1108_v10  ;;  %v1110_v40 = vmul.f32 0.7978846, %v1046_v4 }
 0x1a5   : > { %v1296_v6 = vmul.f32 %v1232_v48, %v784_v12  ;;  %v1234_v60 = vadd.f32 1.0, %v2335_v31  ;;  %2346 = vtanh.f32 %v1112_v16  ;;  %v985_v45 = vmul.f32 %v3423_v28, %v3382_v36 }
 0x1a6   : > { %v1294_v26 = vmul.f32 %v1230_v13, %v782_v27  ;;  %v1114_v15 = vmul.f32 0.7978846, %v1050_v46  ;;  %v1043_v58 = vadd.f32 %v3366_v7, %v3311_v1  ;;  %2348 = vtanh.f32 %v1110_v40  ;;  %v3836_v7 = vld [vmem:[#allocation27_spill] sm:$0xff] }
 0x1a7   : > { %v2337_v8 = vpop.eup %2336  ;;  %v1332_v41 = vpack.c.bf16 %v1296_v6, %v1292_v34  ;;  %v1298_v43 = vmul.f32 %v1234_v60, %v786_v37  ;;  %v1047_v3 = vadd.f32 %v3419_v53, %v3363_v61  ;;  %v779_v23 = vmul.f32 0.5, %v3214_v57 }
 0x1a8   : > { %v2339_v59 = vpop.eup %2338  ;;  %v1227_v21 = vadd.f32 1.0, %v2337_v8  ;;  %2350 = vtanh.f32 %v1114_v15  ;;  %v1107_v20 = vmul.f32 0.7978846, %v1043_v58  ;;  %v783_v5 = vmul.f32 0.5, %v3830_v52 }
 0x1a9   : > { %1682 = vmatprep.mubr.bf16.mxu0 %v1332_v41  ;;  %v1334_v28 = vpack.c.bf16 %v1298_v43, %v1294_v26  ;;  %v1231_v17 = vadd.f32 1.0, %v2339_v59  ;;  %v1111_v39 = vmul.f32 0.7978846, %v1047_v3  ;;  %v1045_v42 = vadd.f32 %v3836_v7, %v3315_v55  ;;  %v3533_v59 = vld [vmem:[%s3627_s4] ss:$0 sm:$0xff] }
 0x1aa   : > { %2352 = vtanh.f32 %v1107_v20  ;;  %v1049_v30 = vadd.f32 %v985_v45, %v3382_v36  ;;  %v1291_v53 = vmul.f32 %v1227_v21, %v779_v23  ;;  %v781_v52 = vmul.f32 0.5, %v3832_v62 }
 0x1ab   : > { %v2341_v14 = vpop.eup %2340  ;;  %1779 = vmatprep.mubr.bf16.mxu1 %v1334_v28  ;;  %v1295_v54 = vmul.f32 %v1231_v17, %v783_v5  ;;  %2354 = vtanh.f32 %v1111_v39  ;;  %v1109_v38 = vmul.f32 0.7978846, %v1045_v42  ;;  %v785_v35 = vmul.f32 0.5, %v3834_v9 }
 0x1ac   : > { %v2343_v57 = vpop.eup %2342  ;;  %v1229_v25 = vadd.f32 1.0, %v2341_v14  ;;  %v1113_v44 = vmul.f32 0.7978846, %v1049_v30  ;;  %v788_v12 = vmul.f32 0.5, %v3331_v47  ;;  %v792_v27 = vmul.f32 0.5, %v3406_v22 }
 0x1ad   : > { %v1331_v19 = vpack.c.bf16 %v1295_v54, %v1291_v53  ;;  %v1233_v49 = vadd.f32 1.0, %v2343_v57  ;;  %2356 = vtanh.f32 %v1109_v38  ;;  %v790_v29 = vmul.f32 0.5, %v3341_v32 }
 0x1ae   : > { %v2345_v56 = vpop.eup %2344  ;;  %v1293_v33 = vmul.f32 %v1229_v25, %v781_v52  ;;  %2358 = vtanh.f32 %v1113_v44  ;;  %v794_v48 = vmul.f32 0.5, %v3416_v18  ;;  %v787_v22 = vmul.f32 0.5, %v3311_v1 }
 0x1af   : > { %v2347_v50 = vpop.eup %2346  ;;  %1683 = vmatmul.mubr.bf16.gmra.mrb[56].mxu0 %v1331_v19  ;;  %v1297_v11 = vmul.f32 %v1233_v49, %v785_v35  ;;  %v1236_v2 = vadd.f32 1.0, %v2345_v56  ;;  %v791_v13 = vmul.f32 0.5, %v3363_v61  ;;  %v789_v58 = vmul.f32 0.5, %v3315_v55 }
 0x1b0   : > { %v1240_v63 = vadd.f32 1.0, %v2347_v50  ;;  %v2349_v0 = vpop.eup %2348  ;;  %v793_v8 = vmul.f32 0.5, %v3382_v36 }
 0x1b1   : > { %v1333_v51 = vpack.c.bf16 %v1297_v11, %v1293_v33  ;;  %v1300_v62 = vmul.f32 %v1236_v2, %v788_v12  ;;  %v1238_v9 = vadd.f32 1.0, %v2349_v0 }
 0x1b2   : > { %v2351_v24 = vpop.eup %2350  ;;  %v1304_v10 = vmul.f32 %v1240_v63, %v792_v27 }
 0x1b3   : > { %1780 = vmatmul.mubr.bf16.gmra.mrb[56].mxu1 %v1333_v51  ;;  %v1242_v16 = vadd.f32 1.0, %v2351_v24  ;;  %v1302_v34 = vmul.f32 %v1238_v9, %v790_v29 }
 0x1b4   : > { %v2353_v4 = vpop.eup %2352  ;;  %v1336_v46 = vpack.c.bf16 %v1304_v10, %v1300_v62 }
 0x1b5   : > { %v2355_v31 = vpop.eup %2354  ;;  %v1306_v47 = vmul.f32 %v1242_v16, %v794_v48  ;;  %v1235_v37 = vadd.f32 1.0, %v2353_v4 }
 0x1b6   : > { %1690 = vmatprep.mubr.bf16.mxu0 %v1336_v46  ;;  %v1239_v6 = vadd.f32 1.0, %v2355_v31 }
 0x1b7   : > { %v1338_v60 = vpack.c.bf16 %v1306_v47, %v1302_v34  ;;  %v2357_v40 = vpop.eup %2356  ;;  %v1299_v45 = vmul.f32 %v1235_v37, %v787_v22 }
 0x1b8   : > { %v1303_v32 = vmul.f32 %v1239_v6, %v791_v13  ;;  %v2359_v26 = vpop.eup %2358  ;;  %v1237_v18 = vadd.f32 1.0, %v2357_v40 }
 0x1b9   : > { %1787 = vmatprep.mubr.bf16.mxu1 %v1338_v60  ;;  %v1241_v41 = vadd.f32 1.0, %v2359_v26 }
 0x1ba   : > { %v1335_v15 = vpack.c.bf16 %v1303_v32, %v1299_v45  ;;  %v1301_v1 = vmul.f32 %v1237_v18, %v789_v58 }
 0x1bb   : > { %v1305_v43 = vmul.f32 %v1241_v41, %v793_v8 }
 0x1bc   : > { %1691 = vmatmul.mubr.bf16.gmra.mrb[60].mxu0 %v1335_v15 }
 0x1bd   : > { %v1337_v61 = vpack.c.bf16 %v1305_v43, %v1301_v1 }
 0x1bf   : > { %1788 = vmatmul.mubr.bf16.gmra.mrb[60].mxu1 %v1337_v61 }
 0x21c   : > { %v1990_v3 = vpop.f32.mrb[32].mxu0 }
 0x21d   : > { %v1991_v23 = vpop.f32.mrb[33].mxu0 }
 0x21e   : > { %v1992_v20 = vadd.f32 %v1991_v23, %v1990_v3  ;;  %v1993_v55 = vpop.f32.mrb[34].mxu0 }
 0x21f   : > { %v2054_v21 = vpop.f32.mrb[32].mxu1  ;;  %v1994_v28 = vpop.f32.mrb[35].mxu0 }
 0x220   : > { %v2055_v36 = vpop.f32.mrb[33].mxu1  ;;  %v1637_v5 = vadd.f32 %v1992_v20, %v3533_v59  ;;  %v1995_v7 = vadd.f32 %v1994_v28, %v1993_v55 }
 0x221   : > { %v2056_v17 = vadd.f32 %v2055_v36, %v2054_v21  ;;  %v2057_v39 = vpop.f32.mrb[34].mxu1 }
 0x222   : > { %v2058_v42 = vpop.f32.mrb[35].mxu1  ;;  %v1640_v14 = vadd.f32 %v1995_v7, %v3533_v59 }
 0x223   : > { %v1734_v30 = vadd.f32 %v2056_v17, %v1637_v5  ;;  %v2059_v53 = vadd.f32 %v2058_v42, %v2057_v39 }
 0x225   : > { %1796 = vst [vmem:[%s3539_s25] sm:$0xff] %v1734_v30  ;;  %v1737_v54 = vadd.f32 %v2059_v53, %v1640_v14 }
 0x227   : > { %1797 = vst [vmem:[%s3539_s25 + $0x8] sm:$0xff] %v1737_v54 }
 0x231   : > { %v1996_v57 = vpop.f32.mrb[36].mxu0 }
 0x232   : > { %v1997_v25 = vpop.f32.mrb[37].mxu0 }
 0x233   : > { %v1998_v38 = vadd.f32 %v1997_v25, %v1996_v57  ;;  %v1999_v44 = vpop.f32.mrb[38].mxu0 }
 0x234   : > { %v2060_v19 = vpop.f32.mrb[36].mxu1  ;;  %v2000_v52 = vpop.f32.mrb[39].mxu0 }
 0x235   : > { %v1645_v35 = vadd.f32 %v1998_v38, %v3533_v59  ;;  %v2061_v49 = vpop.f32.mrb[37].mxu1  ;;  %v2001_v56 = vadd.f32 %v2000_v52, %v1999_v44 }
 0x236   : > { %v2062_v50 = vadd.f32 %v2061_v49, %v2060_v19  ;;  %v2063_v33 = vpop.f32.mrb[38].mxu1 }
 0x237   : > { %v1648_v11 = vadd.f32 %v2001_v56, %v3533_v59  ;;  %v2064_v2 = vpop.f32.mrb[39].mxu1 }
 0x238   : > { %v1742_v12 = vadd.f32 %v2062_v50, %v1645_v35  ;;  %v2065_v27 = vadd.f32 %v2064_v2, %v2063_v33 }
 0x23a   : > { %1798 = vst [vmem:[%s3539_s25 + $0x10] sm:$0xff] %v1742_v12  ;;  %v1745_v63 = vadd.f32 %v2065_v27, %v1648_v11 }
 0x23c   : > { %1799 = vst [vmem:[%s3539_s25 + $0x18] sm:$0xff] %v1745_v63 }
 0x247   : > { %v2002_v0 = vpop.f32.mrb[40].mxu0 }
 0x248   : > { %v2003_v51 = vpop.f32.mrb[41].mxu0 }
 0x249   : > { %v2066_v24 = vpop.f32.mrb[40].mxu1  ;;  %v2004_v62 = vadd.f32 %v2003_v51, %v2002_v0  ;;  %v2005_v10 = vpop.f32.mrb[42].mxu0 }
 0x24a   : > { %v2067_v9 = vpop.f32.mrb[41].mxu1  ;;  %v2006_v29 = vpop.f32.mrb[43].mxu0 }
 0x24b   : > { %v1653_v48 = vadd.f32 %v2004_v62, %v3533_v59  ;;  %v2068_v16 = vadd.f32 %v2067_v9, %v2066_v24  ;;  %v2069_v4 = vpop.f32.mrb[42].mxu1  ;;  %v2007_v46 = vadd.f32 %v2006_v29, %v2005_v10 }
 0x24c   : > { %v2070_v31 = vpop.f32.mrb[43].mxu1 }
 0x24d   : > { %v1750_v34 = vadd.f32 %v2068_v16, %v1653_v48  ;;  %v1656_v47 = vadd.f32 %v2007_v46, %v3533_v59  ;;  %v2071_v37 = vadd.f32 %v2070_v31, %v2069_v4 }
 0x24f   : > { %1800 = vst [vmem:[%s3539_s25 + $0x20] sm:$0xff] %v1750_v34  ;;  %v1753_v22 = vadd.f32 %v2071_v37, %v1656_v47 }
 0x251   : > { %1801 = vst [vmem:[%s3539_s25 + $0x28] sm:$0xff] %v1753_v22 }
 0x25c   : > { %v2008_v13 = vpop.f32.mrb[44].mxu0 }
 0x25d   : > { %v2009_v6 = vpop.f32.mrb[45].mxu0 }
 0x25e   : > { %v2072_v60 = vpop.f32.mrb[44].mxu1  ;;  %v2010_v40 = vadd.f32 %v2009_v6, %v2008_v13  ;;  %v2011_v45 = vpop.f32.mrb[46].mxu0 }
 0x25f   : > { %v2073_v32 = vpop.f32.mrb[45].mxu1  ;;  %v2012_v26 = vpop.f32.mrb[47].mxu0 }
 0x260   : > { %v1661_v18 = vadd.f32 %v2010_v40, %v3533_v59  ;;  %v2074_v15 = vadd.f32 %v2073_v32, %v2072_v60  ;;  %v2075_v58 = vpop.f32.mrb[46].mxu1  ;;  %v2013_v8 = vadd.f32 %v2012_v26, %v2011_v45 }
 0x261   : > { %v2076_v41 = vpop.f32.mrb[47].mxu1 }
 0x262   : > { %v1758_v1 = vadd.f32 %v2074_v15, %v1661_v18  ;;  %v1664_v43 = vadd.f32 %v2013_v8, %v3533_v59  ;;  %v2077_v61 = vadd.f32 %v2076_v41, %v2075_v58 }
 0x264   : > { %1802 = vst [vmem:[%s3539_s25 + $0x30] sm:$0xff] %v1758_v1  ;;  %v1761_v3 = vadd.f32 %v2077_v61, %v1664_v43 }
 0x266   : > { %1803 = vst [vmem:[%s3539_s25 + $0x38] sm:$0xff] %v1761_v3 }
 0x269   : > { %v2014_v23 = vpop.f32.mrb[48].mxu0 }
 0x26a   : > { %v2015_v21 = vpop.f32.mrb[49].mxu0 }
 0x26b   : > { %v2078_v20 = vpop.f32.mrb[48].mxu1  ;;  %v2016_v55 = vadd.f32 %v2015_v21, %v2014_v23  ;;  %v2017_v36 = vpop.f32.mrb[50].mxu0 }
 0x26c   : > { %v2079_v28 = vpop.f32.mrb[49].mxu1  ;;  %v2018_v5 = vpop.f32.mrb[51].mxu0 }
 0x26d   : > { %v1669_v17 = vadd.f32 %v2016_v55, %v3533_v59  ;;  %v2080_v39 = vadd.f32 %v2079_v28, %v2078_v20  ;;  %v2081_v7 = vpop.f32.mrb[50].mxu1  ;;  %v2019_v42 = vadd.f32 %v2018_v5, %v2017_v36 }
 0x26e   : > { %v2082_v30 = vpop.f32.mrb[51].mxu1 }
 0x26f   : > { %v1766_v14 = vadd.f32 %v2080_v39, %v1669_v17  ;;  %v1672_v53 = vadd.f32 %v2019_v42, %v3533_v59  ;;  %v2083_v54 = vadd.f32 %v2082_v30, %v2081_v7 }
 0x271   : > { %1804 = vst [vmem:[%s3539_s25 + $0x40] sm:$0xff] %v1766_v14  ;;  %v1769_v57 = vadd.f32 %v2083_v54, %v1672_v53 }
 0x273   : > { %1805 = vst [vmem:[%s3539_s25 + $0x48] sm:$0xff] %v1769_v57 }
 0x275   : > { %v2020_v25 = vpop.f32.mrb[52].mxu0 }
 0x276   : > { %v2021_v38 = vpop.f32.mrb[53].mxu0 }
 0x277   : > { %v2084_v44 = vpop.f32.mrb[52].mxu1  ;;  %v2022_v19 = vadd.f32 %v2021_v38, %v2020_v25  ;;  %v2023_v52 = vpop.f32.mrb[54].mxu0 }
 0x278   : > { %v2085_v35 = vpop.f32.mrb[53].mxu1  ;;  %v2024_v49 = vpop.f32.mrb[55].mxu0 }
 0x279   : > { %v1677_v56 = vadd.f32 %v2022_v19, %v3533_v59  ;;  %v2086_v50 = vadd.f32 %v2085_v35, %v2084_v44  ;;  %v2087_v33 = vpop.f32.mrb[54].mxu1  ;;  %v2025_v11 = vadd.f32 %v2024_v49, %v2023_v52 }
 0x27a   : > { %v2088_v2 = vpop.f32.mrb[55].mxu1 }
 0x27b   : > { %v1774_v12 = vadd.f32 %v2086_v50, %v1677_v56  ;;  %v1680_v27 = vadd.f32 %v2025_v11, %v3533_v59  ;;  %v2089_v63 = vadd.f32 %v2088_v2, %v2087_v33 }
 0x27d   : > { %1806 = vst [vmem:[%s3539_s25 + $0x50] sm:$0xff] %v1774_v12  ;;  %v1777_v0 = vadd.f32 %v2089_v63, %v1680_v27 }
 0x27f   : > { %1807 = vst [vmem:[%s3539_s25 + $0x58] sm:$0xff] %v1777_v0 }
 0x282   : > { %v2026_v51 = vpop.f32.mrb[56].mxu0 }
 0x283   : > { %v2027_v24 = vpop.f32.mrb[57].mxu0 }
 0x284   : > { %v2028_v62 = vadd.f32 %v2027_v24, %v2026_v51  ;;  %v2029_v10 = vpop.f32.mrb[58].mxu0 }
 0x285   : > { %v2030_v9 = vpop.f32.mrb[59].mxu0 }
 0x286   : > { %v2090_v29 = vpop.f32.mrb[56].mxu1  ;;  %v1685_v48 = vadd.f32 %v2028_v62, %v3533_v59  ;;  %v2031_v16 = vadd.f32 %v2030_v9, %v2029_v10 }
 0x287   : > { %v2091_v4 = vpop.f32.mrb[57].mxu1 }
 0x288   : > { %v2092_v46 = vadd.f32 %v2091_v4, %v2090_v29  ;;  %v2093_v31 = vpop.f32.mrb[58].mxu1  ;;  %v1688_v34 = vadd.f32 %v2031_v16, %v3533_v59 }
 0x289   : > { %v2094_v47 = vpop.f32.mrb[59].mxu1 }
 0x28a   : > { %v1782_v37 = vadd.f32 %v2092_v46, %v1685_v48  ;;  %v2095_v22 = vadd.f32 %v2094_v47, %v2093_v31 }
 0x28c   : > { %1808 = vst [vmem:[%s3539_s25 + $0x60] sm:$0xff] %v1782_v37  ;;  %v1785_v13 = vadd.f32 %v2095_v22, %v1688_v34 }
 0x28e   : > { %1809 = vst [vmem:[%s3539_s25 + $0x68] sm:$0xff] %v1785_v13 }
 0x28f   : > { %v2032_v6 = vpop.f32.mrb[60].mxu0 }
 0x290   : > { %v2033_v60 = vpop.f32.mrb[61].mxu0 }
 0x291   : > { %v2034_v40 = vadd.f32 %v2033_v60, %v2032_v6  ;;  %v2035_v45 = vpop.f32.mrb[62].mxu0 }
 0x292   : > { %v2036_v32 = vpop.f32.mrb[63].mxu0  ;;  %v2096_v26 = vpop.f32.mrb[60].mxu1 }
 0x293   : > { %v1693_v18 = vadd.f32 %v2034_v40, %v3533_v59  ;;  %v2037_v15 = vadd.f32 %v2036_v32, %v2035_v45  ;;  %v2097_v58 = vpop.f32.mrb[61].mxu1 }
 0x294   : > { %v2098_v8 = vadd.f32 %v2097_v58, %v2096_v26  ;;  %v2099_v41 = vpop.f32.mrb[62].mxu1 }
 0x295   : > { %v1696_v1 = vadd.f32 %v2037_v15, %v3533_v59  ;;  %v2100_v43 = vpop.f32.mrb[63].mxu1 }
 0x296   : > { %v1790_v61 = vadd.f32 %v2098_v8, %v1693_v18  ;;  %v2101_v3 = vadd.f32 %v2100_v43, %v2099_v41 }
 0x298   : > { %1810 = vst [vmem:[%s3539_s25 + $0x70] sm:$0xff] %v1790_v61  ;;  %v1793_v23 = vadd.f32 %v2101_v3, %v1696_v1 }
 0x29a   : > { %1811 = vst [vmem:[%s3539_s25 + $0x78] sm:$0xff] %v1793_v23 }
 0x29b   : > { %2373 = shalt.err (!%p2370_p3)
}
 0x29c   : > { %s2374_s14 = scalar_lea.hbm %s3574_s9, 2048  ;;  %s2378_s17 = scalar_lea.hbm %s3628_s5, 4096 }
 0x29d   : > { %p2375_p4 = scmp.ne.s32.totalorder %s3574_s9, %s2374_s14  ;;  %p2379_p9 = scmp.lt.u32.totalorder %s3574_s9, %s3628_s5 }
 0x29e   : > { %p2380_p10 = scmp.lt.u32.totalorder %s2378_s17, %s2374_s14  ;;  %p2382_p12 = scmp.lt.u32.totalorder %s2374_s14, %s3574_s9 }
 0x29f   : > { %p2376_p7 = pnand %p2375_p4, %p2496_p5 }
 0x2a0   : > { %p2381_p11 = por %p2380_p10, %p2379_p9 }
 0x2a1   : > { %p2377_p8 = pneg %p2376_p7 }
 0x2a2   : > { %p2383_p13 = por %p2382_p12, %p2381_p11 }
 0x2a4   : > { %p2384_p0 = pnand %p2383_p13, %p2377_p8 }
 0x2a6   : > { %2387 = shalt.err (!%p2384_p0)
}
 0x2a7   : > { %s2426_s25 = smov 128   ;;  %s2427_s30 = smov 8  }
 0x2a8   : > { %2102 = dma.vmem_to_hbm [thread:$0]  (%p2496_p5), %s3576_s13, 2048, %s3574_s9, %s3582_s10, %s2426_s25, %s2426_s25, %s2427_s30  }
 0x2a9 PF: > { %p2108_p1 = scmp.ge.s32.totalorder %s2422_s21, 2  ;;  %s1841_s6 = sand.u32 1, %s2410_s18  }
 0x2aa   : > { %s1842_s8 = scalar_lea.sflag [#allocation3], %s1841_s6 }
 0x2ab   : > { %p2105_p2 = pnand %p2108_p1, %p2500_p6 }
 0x2ad   : > { %2405 = dma.done.wait (!%p2105_p2), %s1842_s8, 2048  }
 0x2ae   : > { %2407 = vsyncadd (!%p2105_p2), %s1842_s8, 4294965248  ;;  %p15_p3 = scmp.ge.s32.totalorder %s2483_s24, 4   ;;  %s3837_s18 = smov %s2414_s19 }
 0x2af   : > { %s3838_s19 = smov %s2418_s20  ;;  %s3839_s20 = smov %s2494_s27 }
 0x2b0   : > { %s3840_s21 = smov %s2483_s24  ;;  %17 = sbr.rel (!%p15_p3) target bundleno = 3 (0x3), region = 75 }
 0x2b7   :  { %1847 = vsyncpa [#allocation3], 1 }
 0x2b8   :  { %1849 = vsyncpa [#allocation3 + $0x1], 1 }

</bundles_post_ra>
